<compile_context>
chip_gen: v5e
topology: v5e:2x2
jax: 0.10.0
libtpu: 0.0.40
codegen_flags: <defaults>
</compile_context>

<pallas_src>
import functools

import jax
import jax.numpy as jnp
from jax.experimental import pallas as pl
from jax.experimental.pallas import tpu as pltpu

IN_FEATURES = 28 * 28        # 784 (logical)
IN_PAD = 896                 # 7 * 128, lane-dense padded feature width
HIDDEN = 512
N_OUT = 10
OUT_PAD = 128                # lane-dense padded output width
DEFAULT_TILE_B = 512         # resident weights + tiles are only a few MiB of VMEM
VMEM_LIMIT_BYTES = 32 * 1024 * 1024


def _cdiv(a, b):
    return -(-a // b)


def _round_up(n, m):
    return _cdiv(n, m) * m


def _choose_tiles(batch, max_tile):
    """Pick a sublane-aligned batch tile and padded batch size.

    Guarantees >= 2 grid steps whenever the batch allows it (keeps both v7x
    TensorCores busy) and avoids padding a whole extra tile of zero rows for
    batches just over a tile multiple.
    """
    b8 = _round_up(max(batch, 1), 8)
    min_steps = 2 if b8 >= 16 else 1
    n_steps = max(_cdiv(b8, max_tile), min_steps)
    tb = _round_up(_cdiv(b8, n_steps), 8)
    bp = tb * n_steps
    return tb, bp, n_steps


def mlp_kernel(x_ref, w1_ref, b1_ref, w2_ref, b2_ref, w3_ref, b3_ref, o_ref):
    # Per-grid-step tile: (TILE_B, 896) bf16 activations; all weights resident in
    # VMEM. MXU accumulates in fp32; bias-add + ReLU epilogues run in bf16
    # (single downcast of the accumulator), which halves VALU/vreg traffic on
    # v6e/v7x and is numerically harmless at the module's tolerance.
    x = x_ref[...]                                                     # bf16

    a1 = jnp.dot(x, w1_ref[...], preferred_element_type=jnp.float32)
    h1 = jnp.maximum(a1.astype(jnp.bfloat16) + b1_ref[...], 0)

    a2 = jnp.dot(h1, w2_ref[...], preferred_element_type=jnp.float32)
    h2 = jnp.maximum(a2.astype(jnp.bfloat16) + b2_ref[...], 0)

    a3 = jnp.dot(h2, w3_ref[...], preferred_element_type=jnp.float32)
    o_ref[...] = jnp.maximum(a3.astype(jnp.bfloat16) + b3_ref[...], 0).astype(o_ref.dtype)


def mlp_forward(x_img, kernel_params, *, tile_b=DEFAULT_TILE_B):
    """x_img: (B, 1, 28, 28) float (or bfloat16). kernel_params: prepared bf16
    weights (feature-padded W1, lane-padded last layer). Returns logits
    (B, 10) float32."""
    w1, b1, w2, b2, w3p, b3p = kernel_params
    B = x_img.shape[0]

    tb, Bp, _ = _choose_tiles(B, tile_b)
    grid = (Bp // tb,)

    # Single producer pass: flatten (free reshape) + zero-pad batch/features +
    # cast to bf16. Under jit this fuses into one HBM write of the padded x.
    x = x_img.reshape(B, -1)
    x = jnp.pad(x, ((0, Bp - B), (0, IN_PAD - IN_FEATURES))).astype(jnp.bfloat16)

    flops = 2 * Bp * (IN_PAD * HIDDEN + HIDDEN * HIDDEN + HIDDEN * OUT_PAD)
    bytes_accessed = (
        (IN_PAD * HIDDEN + HIDDEN * HIDDEN + HIDDEN * OUT_PAD) * 2   # bf16 weights
        + (HIDDEN + HIDDEN + OUT_PAD) * 2                            # bf16 biases
        + Bp * IN_PAD * 2                                            # bf16 x in
        + Bp * OUT_PAD * 2                                           # bf16 out
    )

    out = pl.pallas_call(
        mlp_kernel,
        out_shape=jax.ShapeDtypeStruct((Bp, OUT_PAD), jnp.bfloat16),
        grid_spec=pltpu.PrefetchScalarGridSpec(
            num_scalar_prefetch=0,
            grid=grid,
            in_specs=[
                pl.BlockSpec((tb, IN_PAD), lambda i: (i, 0)),        # x tile
                pl.BlockSpec((IN_PAD, HIDDEN), lambda i: (0, 0)),    # W1 resident
                pl.BlockSpec((1, HIDDEN), lambda i: (0, 0)),         # b1
                pl.BlockSpec((HIDDEN, HIDDEN), lambda i: (0, 0)),    # W2 resident
                pl.BlockSpec((1, HIDDEN), lambda i: (0, 0)),         # b2
                pl.BlockSpec((HIDDEN, OUT_PAD), lambda i: (0, 0)),   # W3 (lane-padded)
                pl.BlockSpec((1, OUT_PAD), lambda i: (0, 0)),        # b3 (lane-padded)
            ],
            out_specs=pl.BlockSpec((tb, OUT_PAD), lambda i: (i, 0)),
        ),
        compiler_params=pltpu.CompilerParams(
            dimension_semantics=("parallel",),       # shard batch tiles over v7x's 2 TCs
            vmem_limit_bytes=VMEM_LIMIT_BYTES,
        ),
        cost_estimate=pl.CostEstimate(
            flops=flops, transcendentals=0, bytes_accessed=bytes_accessed),
    )(x, w1, b1, w2, b2, w3p, b3p)

    return out[:B, :N_OUT].astype(jnp.float32)


def init_params(key):
    """Deterministic fp32 parameter init matching nn.Linear shapes/defaults.

    PyTorch stores W as (out, in); we store (in, out) for x @ W.
    Uses uniform(-1/sqrt(fan_in), 1/sqrt(fan_in)) like nn.Linear's default.
    """
    def linear(k, fan_in, fan_out):
        kw, kb = jax.random.split(k)
        bound = 1.0 / jnp.sqrt(fan_in)
        w = jax.random.uniform(kw, (fan_in, fan_out), jnp.float32, -bound, bound)
        b = jax.random.uniform(kb, (1, fan_out), jnp.float32, -bound, bound)
        return w, b

    k1, k2, k3 = jax.random.split(key, 3)
    w1, b1 = linear(k1, IN_FEATURES, HIDDEN)
    w2, b2 = linear(k2, HIDDEN, HIDDEN)
    w3, b3 = linear(k3, HIDDEN, N_OUT)
    return w1, b1, w2, b2, w3, b3


def prepare_kernel_params(params_f32):
    """Cast weights/biases to bf16, zero-pad W1's input dim 784->896 and the last
    layer's output width 10->128 lanes."""
    w1, b1, w2, b2, w3, b3 = params_f32
    w1p = jnp.pad(w1, ((0, IN_PAD - IN_FEATURES), (0, 0)))
    w3p = jnp.pad(w3, ((0, 0), (0, OUT_PAD - N_OUT)))
    b3p = jnp.pad(b3, ((0, 0), (0, OUT_PAD - N_OUT)))
    return (
        w1p.astype(jnp.bfloat16), b1.astype(jnp.bfloat16),
        w2.astype(jnp.bfloat16), b2.astype(jnp.bfloat16),
        w3p.astype(jnp.bfloat16), b3p.astype(jnp.bfloat16),
    )


def reference_forward(x_img, params_f32):
    """Pure-JAX fp32 reference of the PyTorch forward pass."""
    w1, b1, w2, b2, w3, b3 = params_f32
    x = x_img.reshape(x_img.shape[0], -1)
    h = jnp.maximum(x @ w1 + b1, 0.0)
    h = jnp.maximum(h @ w2 + b2, 0.0)
    return jnp.maximum(h @ w3 + b3, 0.0)


if __name__ == "__main__":
    key = jax.random.PRNGKey(0)
    kx, kp = jax.random.split(key)

    B = 8  # small, sublane-aligned test batch
    x = jax.random.normal(kx, (B, 1, 28, 28), jnp.float32)

    params_f32 = init_params(kp)
    kernel_params = prepare_kernel_params(params_f32)

    # jit so the flatten/pad/bf16-cast of x fuses into a single producer pass.
    fwd = jax.jit(functools.partial(mlp_forward, kernel_params=kernel_params))
    out = jax.block_until_ready(fwd(x))

    ref = reference_forward(x, params_f32)
    assert out.shape == (B, N_OUT)
    # bf16 matmul inputs + bf16 epilogue (fp32 MXU accumulate) vs fp32 reference.
    assert jnp.allclose(out, ref, atol=7e-2, rtol=5e-2), "mismatch vs reference"

    print("KERNEL_OK")
</pallas_src>

<mosaic_0001>
module attributes {stable_mosaic.version = 11 : i64} {
  func.func @mlp_kernel(%arg0: i32, %arg1: memref<8x896xbf16, #tpu.memory_space<vmem>>, %arg2: memref<896x512xbf16, #tpu.memory_space<vmem>>, %arg3: memref<1x512xbf16, #tpu.memory_space<vmem>>, %arg4: memref<512x512xbf16, #tpu.memory_space<vmem>>, %arg5: memref<1x512xbf16, #tpu.memory_space<vmem>>, %arg6: memref<512x128xbf16, #tpu.memory_space<vmem>>, %arg7: memref<1x128xbf16, #tpu.memory_space<vmem>>, %arg8: memref<8x128xbf16, #tpu.memory_space<vmem>>) attributes {dimension_semantics = [#tpu.dimension_semantics<parallel>], iteration_bounds = array<i64: 1>, scalar_prefetch = 0 : i64, scratch_operands = 0 : i64, tpu.core_type = #tpu.core_type<tc>, window_params = [{transform_indices = @transform_0, window_bounds = array<i64: 8, 896>}, {pipeline_mode = #tpu.pipeline_mode<synchronous>, transform_indices = @transform_1, window_bounds = array<i64: 896, 512>}, {pipeline_mode = #tpu.pipeline_mode<synchronous>, transform_indices = @transform_2, window_bounds = array<i64: 1, 512>}, {pipeline_mode = #tpu.pipeline_mode<synchronous>, transform_indices = @transform_3, window_bounds = array<i64: 512, 512>}, {pipeline_mode = #tpu.pipeline_mode<synchronous>, transform_indices = @transform_4, window_bounds = array<i64: 1, 512>}, {pipeline_mode = #tpu.pipeline_mode<synchronous>, transform_indices = @transform_5, window_bounds = array<i64: 512, 128>}, {pipeline_mode = #tpu.pipeline_mode<synchronous>, transform_indices = @transform_6, window_bounds = array<i64: 1, 128>}, {transform_indices = @transform_7, window_bounds = array<i64: 8, 128>}]} {
    %c0 = arith.constant 0 : index
    %c0_0 = arith.constant 0 : index
    %0 = vector.load %arg1[%c0, %c0_0] : memref<8x896xbf16, #tpu.memory_space<vmem>>, vector<8x896xbf16>
    %c0_1 = arith.constant 0 : index
    %c0_2 = arith.constant 0 : index
    %1 = vector.load %arg2[%c0_1, %c0_2] : memref<896x512xbf16, #tpu.memory_space<vmem>>, vector<896x512xbf16>
    %cst = arith.constant dense<0.000000e+00> : vector<8x512xf32>
    %2 = tpu.matmul %0, %1, %cst {dimension_numbers = #tpu.dot_dimension_numbers<[1], [0], [0], [1], [0, 0, 1, 1], [], []>} : vector<8x896xbf16>, vector<896x512xbf16>, vector<8x512xf32> -> vector<8x512xf32>
    %3 = arith.truncf %2 : vector<8x512xf32> to vector<8x512xbf16>
    %c0_3 = arith.constant 0 : index
    %c0_4 = arith.constant 0 : index
    %4 = vector.load %arg3[%c0_3, %c0_4] : memref<1x512xbf16, #tpu.memory_space<vmem>>, vector<1x512xbf16>
    %5 = vector.broadcast %4 : vector<1x512xbf16> to vector<8x512xbf16>
    %6 = arith.addf %3, %5 : vector<8x512xbf16>
    %cst_5 = arith.constant 0.000000e+00 : bf16
    %7 = vector.broadcast %cst_5 : bf16 to vector<8x512xbf16>
    %8 = arith.maximumf %6, %7 : vector<8x512xbf16>
    %c0_6 = arith.constant 0 : index
    %c0_7 = arith.constant 0 : index
    %9 = vector.load %arg4[%c0_6, %c0_7] : memref<512x512xbf16, #tpu.memory_space<vmem>>, vector<512x512xbf16>
    %cst_8 = arith.constant dense<0.000000e+00> : vector<8x512xf32>
    %10 = tpu.matmul %8, %9, %cst_8 {dimension_numbers = #tpu.dot_dimension_numbers<[1], [0], [0], [1], [0, 0, 1, 1], [], []>} : vector<8x512xbf16>, vector<512x512xbf16>, vector<8x512xf32> -> vector<8x512xf32>
    %11 = arith.truncf %10 : vector<8x512xf32> to vector<8x512xbf16>
    %c0_9 = arith.constant 0 : index
    %c0_10 = arith.constant 0 : index
    %12 = vector.load %arg5[%c0_9, %c0_10] : memref<1x512xbf16, #tpu.memory_space<vmem>>, vector<1x512xbf16>
    %13 = vector.broadcast %12 : vector<1x512xbf16> to vector<8x512xbf16>
    %14 = arith.addf %11, %13 : vector<8x512xbf16>
    %cst_11 = arith.constant 0.000000e+00 : bf16
    %15 = vector.broadcast %cst_11 : bf16 to vector<8x512xbf16>
    %16 = arith.maximumf %14, %15 : vector<8x512xbf16>
    %c0_12 = arith.constant 0 : index
    %c0_13 = arith.constant 0 : index
    %17 = vector.load %arg6[%c0_12, %c0_13] : memref<512x128xbf16, #tpu.memory_space<vmem>>, vector<512x128xbf16>
    %cst_14 = arith.constant dense<0.000000e+00> : vector<8x128xf32>
    %18 = tpu.matmul %16, %17, %cst_14 {dimension_numbers = #tpu.dot_dimension_numbers<[1], [0], [0], [1], [0, 0, 1, 1], [], []>} : vector<8x512xbf16>, vector<512x128xbf16>, vector<8x128xf32> -> vector<8x128xf32>
    %19 = arith.truncf %18 : vector<8x128xf32> to vector<8x128xbf16>
    %c0_15 = arith.constant 0 : index
    %c0_16 = arith.constant 0 : index
    %20 = vector.load %arg7[%c0_15, %c0_16] : memref<1x128xbf16, #tpu.memory_space<vmem>>, vector<1x128xbf16>
    %21 = vector.broadcast %20 : vector<1x128xbf16> to vector<8x128xbf16>
    %22 = arith.addf %19, %21 : vector<8x128xbf16>
    %cst_17 = arith.constant 0.000000e+00 : bf16
    %23 = vector.broadcast %cst_17 : bf16 to vector<8x128xbf16>
    %24 = arith.maximumf %22, %23 : vector<8x128xbf16>
    %c0_18 = arith.constant 0 : index
    %c0_19 = arith.constant 0 : index
    %25 = vector.load %arg8[%c0_18, %c0_19] : memref<8x128xbf16, #tpu.memory_space<vmem>>, vector<8x128xbf16>
    tpu.vector_store %arg8[%c0_18, %c0_19], %24 {strides = array<i32>} : memref<8x128xbf16, #tpu.memory_space<vmem>>, vector<8x128xbf16>,
    return
  }
  func.func @transform_0(%arg0: i32) -> (i32, i32) {
    %c0_i32 = arith.constant 0 : i32
    %c0_i32_0 = arith.constant 0 : i32
    return %arg0, %c0_i32 : i32, i32
  }
  func.func @transform_1(%arg0: i32) -> (i32, i32) {
    %c0_i32 = arith.constant 0 : i32
    %c0_i32_0 = arith.constant 0 : i32
    %c0_i32_1 = arith.constant 0 : i32
    return %c0_i32, %c0_i32_0 : i32, i32
  }
  func.func @transform_2(%arg0: i32) -> (i32, i32) {
    %c0_i32 = arith.constant 0 : i32
    %c0_i32_0 = arith.constant 0 : i32
    %c0_i32_1 = arith.constant 0 : i32
    return %c0_i32, %c0_i32_0 : i32, i32
  }
  func.func @transform_3(%arg0: i32) -> (i32, i32) {
    %c0_i32 = arith.constant 0 : i32
    %c0_i32_0 = arith.constant 0 : i32
    %c0_i32_1 = arith.constant 0 : i32
    return %c0_i32, %c0_i32_0 : i32, i32
  }
  func.func @transform_4(%arg0: i32) -> (i32, i32) {
    %c0_i32 = arith.constant 0 : i32
    %c0_i32_0 = arith.constant 0 : i32
    %c0_i32_1 = arith.constant 0 : i32
    return %c0_i32, %c0_i32_0 : i32, i32
  }
  func.func @transform_5(%arg0: i32) -> (i32, i32) {
    %c0_i32 = arith.constant 0 : i32
    %c0_i32_0 = arith.constant 0 : i32
    %c0_i32_1 = arith.constant 0 : i32
    return %c0_i32, %c0_i32_0 : i32, i32
  }
  func.func @transform_6(%arg0: i32) -> (i32, i32) {
    %c0_i32 = arith.constant 0 : i32
    %c0_i32_0 = arith.constant 0 : i32
    %c0_i32_1 = arith.constant 0 : i32
    return %c0_i32, %c0_i32_0 : i32, i32
  }
  func.func @transform_7(%arg0: i32) -> (i32, i32) {
    %c0_i32 = arith.constant 0 : i32
    %c0_i32_0 = arith.constant 0 : i32
    return %arg0, %c0_i32 : i32, i32
  }
}

</mosaic_0001>

<bundles_post_ra>
// kernel: mlp_forward.1
= control target key start
LH: loop header
LB: loop body
LE: loop exit
PB: predicated region body
PF: predicated region fallthrough
CT: control target
= control target key end

     0   :  { %12 = vsyncpa [#allocation3], 0  ;;  %s5453_s0 = inlined_call_operand.vmem [shape: bf16[8,896], index: 0, kind: input, shape index: {}]   ;;  %s5454_s1 = inlined_call_operand.hbm [shape: bf16[896,512], index: 1, kind: input, shape index: {}]   ;;  %s5455_s2 = inlined_call_operand.vmem [shape: bf16[1,512], index: 2, kind: input, shape index: {}]   ;;  %s5456_s3 = inlined_call_operand.hbm [shape: bf16[512,512], index: 3, kind: input, shape index: {}]   ;;  %s5457_s4 = inlined_call_operand.vmem [shape: bf16[1,512], index: 4, kind: input, shape index: {}]   ;;  %s5458_s5 = inlined_call_operand.vmem [shape: bf16[512,128], index: 5, kind: input, shape index: {}]   ;;  %s5459_s6 = inlined_call_operand.vmem [shape: bf16[1,128], index: 6, kind: input, shape index: {}]   ;;  %s5460_s7 = inlined_call_operand.vmem [shape: bf16[8,128], index: 7, kind: output, shape index: {}]  }
   0x1   :  { %s20_s26 = sshll.u32 %s5454_s1, 4  ;;  %s21_s26 = int_to_ptr.hbm [resolvable:$true] %s20_s26 }
   0x2   :  { %13 = vsyncpa [#allocation5], 0  ;;  %s5169_s27 = smov [#allocation2]   ;;  %s35_s8 = sshll.u32 %s5456_s3, 4  ;;  %s36_s8 = int_to_ptr.hbm [resolvable:$true] %s35_s8 }
   0x3   :  { %s22_s28 = sshll.u32 %s5169_s27, 4  ;;  %s5170_s9 = smov 256   ;;  %s23_s28 = int_to_ptr.vmem [resolvable:$true] %s22_s28 }
   0x4   :  { %s5171_s10 = smov 16   ;;  %s5172_s11 = smov [#allocation4]  }
   0x5   :  { %28 = dma.hbm_to_vmem [thread:$0]  %s21_s26, 28672, %s23_s28, [#allocation3], %s5170_s9, %s5170_s9, %s5171_s10  }
   0x6   :  { %s37_s12 = sshll.u32 %s5172_s11, 4  ;;  %s38_s12 = int_to_ptr.vmem [resolvable:$true] %s37_s12 }
   0x7   :  { %43 = dma.hbm_to_vmem [thread:$0]  %s36_s8, 16384, %s38_s12, [#allocation5], %s5170_s9, %s5170_s9, %s5171_s10  }
   0x8   :  { %5165 = dma.done.wait [#allocation3], 28672  }
   0x9   :  { %5166 = vsyncadd [#allocation3], 4294938624 }
   0xa   :  { %5167 = dma.done.wait [#allocation5], 16384  }
   0xb   :  { %5168 = vsyncadd [#allocation5], 4294950912  ;;  %v3307_v0 = vld [vmem:[#allocation2 + $0xe0] sm:$0xf]  ;;  %v4759_v1 = vld [vmem:[#allocation2 + $0xec] sm:$0xf0] }
   0xc   :  { %v3435_v2 = vld [vmem:[#allocation2 + $0x1e0] sm:$0xf]  ;;  %v3308_v3 = vor.u32 %v4759_v1, %v3307_v0  ;;  %v4791_v4 = vld [vmem:[#allocation2 + $0x1ec] sm:$0xf0] }
   0xd   :  { %v3563_v5 = vld [vmem:[#allocation2 + $0x2e0] sm:$0xf]  ;;  %v4823_v6 = vld [vmem:[#allocation2 + $0x2ec] sm:$0xf0]  ;;  %v3436_v7 = vor.u32 %v4791_v4, %v3435_v2 }
   0xe   :  { %v3564_v8 = vor.u32 %v4823_v6, %v3563_v5  ;;  %v3691_v9 = vld [vmem:[#allocation2 + $0x3e0] sm:$0xf]  ;;  %v4855_v10 = vld [vmem:[#allocation2 + $0x3ec] sm:$0xf0]  ;;  %1431 = vmatpush.bf16.msra.mxu0 %v3308_v3 }
   0xf   :  { %v3291_v11 = vld [vmem:[#allocation2 + $0xc0] sm:$0xf]  ;;  %v3692_v12 = vor.u32 %v4855_v10, %v3691_v9  ;;  %v4755_v13 = vld [vmem:[#allocation2 + $0xcc] sm:$0xf0]  ;;  %1444 = vmatpush.bf16.msra.mxu1 %v3436_v7 }
  0x10   :  { %v3419_v14 = vld [vmem:[#allocation2 + $0x1c0] sm:$0xf]  ;;  %v4787_v15 = vld [vmem:[#allocation2 + $0x1cc] sm:$0xf0]  ;;  %1457 = vmatpush.bf16.msra.mxu2 %v3564_v8  ;;  %v3292_v16 = vor.u32 %v4755_v13, %v3291_v11 }
  0x11   :  { %v3420_v17 = vor.u32 %v4787_v15, %v3419_v14  ;;  %v3547_v18 = vld [vmem:[#allocation2 + $0x2c0] sm:$0xf]  ;;  %v4819_v19 = vld [vmem:[#allocation2 + $0x2cc] sm:$0xf0]  ;;  %1470 = vmatpush.bf16.msra.mxu3 %v3692_v12 }
  0x12   :  { %v3675_v20 = vld [vmem:[#allocation2 + $0x3c0] sm:$0xf]  ;;  %v3548_v21 = vor.u32 %v4819_v19, %v3547_v18  ;;  %v4851_v22 = vld [vmem:[#allocation2 + $0x3cc] sm:$0xf0]  ;;  %1432 = vmatpush.bf16.msra.mxu0 %v3292_v16 }
  0x13   :  { %v3275_v23 = vld [vmem:[#allocation2 + $0xa0] sm:$0xf]  ;;  %v4751_v24 = vld [vmem:[#allocation2 + $0xac] sm:$0xf0]  ;;  %v3676_v25 = vor.u32 %v4851_v22, %v3675_v20  ;;  %1445 = vmatpush.bf16.msra.mxu1 %v3420_v17 }
  0x14   :  { %v3403_v26 = vld [vmem:[#allocation2 + $0x1a0] sm:$0xf]  ;;  %v4783_v27 = vld [vmem:[#allocation2 + $0x1ac] sm:$0xf0]  ;;  %v3276_v29 = vor.u32 %v4751_v24, %v3275_v23  ;;  %1458 = vmatpush.bf16.msra.mxu2 %v3548_v21 }
  0x15   :  { %v3531_v28 = vld [vmem:[#allocation2 + $0x2a0] sm:$0xf]  ;;  %v4815_v30 = vld [vmem:[#allocation2 + $0x2ac] sm:$0xf0]  ;;  %v3404_v33 = vor.u32 %v4783_v27, %v3403_v26  ;;  %1471 = vmatpush.bf16.msra.mxu3 %v3676_v25 }
  0x16   :  { %v3659_v31 = vld [vmem:[#allocation2 + $0x3a0] sm:$0xf]  ;;  %v4847_v32 = vld [vmem:[#allocation2 + $0x3ac] sm:$0xf0]  ;;  %v3532_v34 = vor.u32 %v4815_v30, %v3531_v28  ;;  %1433 = vmatpush.bf16.msra.mxu0 %v3276_v29 }
  0x17   :  { %v3259_v35 = vld [vmem:[#allocation2 + $0x80] sm:$0xf]  ;;  %v4747_v36 = vld [vmem:[#allocation2 + $0x8c] sm:$0xf0]  ;;  %v3660_v38 = vor.u32 %v4847_v32, %v3659_v31  ;;  %1446 = vmatpush.bf16.msra.mxu1 %v3404_v33 }
  0x18   :  { %v3387_v37 = vld [vmem:[#allocation2 + $0x180] sm:$0xf]  ;;  %v4779_v39 = vld [vmem:[#allocation2 + $0x18c] sm:$0xf0]  ;;  %v3260_v44 = vor.u32 %v4747_v36, %v3259_v35  ;;  %1459 = vmatpush.bf16.msra.mxu2 %v3532_v34 }
  0x19   :  { %v3515_v40 = vld [vmem:[#allocation2 + $0x280] sm:$0xf]  ;;  %v4811_v41 = vld [vmem:[#allocation2 + $0x28c] sm:$0xf0]  ;;  %v3388_v45 = vor.u32 %v4779_v39, %v3387_v37  ;;  %1472 = vmatpush.bf16.msra.mxu3 %v3660_v38  ;;  %v4757_v37 = vld [vmem:[#allocation2 + $0xe4] sm:$0xf] }
  0x1a   :  { %v3643_v42 = vld [vmem:[#allocation2 + $0x380] sm:$0xf]  ;;  %v4843_v43 = vld [vmem:[#allocation2 + $0x38c] sm:$0xf0]  ;;  %v3516_v46 = vor.u32 %v4811_v41, %v3515_v40  ;;  %1434 = vmatpush.bf16.msra.mxu0 %v3260_v44  ;;  %v3309_v38 = vld [vmem:[#allocation2 + $0xf0] sm:$0xf0] }
  0x1b   :  { %v3243_v47 = vld [vmem:[#allocation2 + $0x60] sm:$0xf]  ;;  %v4743_v48 = vld [vmem:[#allocation2 + $0x6c] sm:$0xf0]  ;;  %v3644_v50 = vor.u32 %v4843_v43, %v3643_v42  ;;  %1447 = vmatpush.bf16.msra.mxu1 %v3388_v45 }
  0x1c   :  { %v3371_v49 = vld [vmem:[#allocation2 + $0x160] sm:$0xf]  ;;  %v4775_v51 = vld [vmem:[#allocation2 + $0x16c] sm:$0xf0]  ;;  %v3244_v56 = vor.u32 %v4743_v48, %v3243_v47  ;;  %1460 = vmatpush.bf16.msra.mxu2 %v3516_v46  ;;  %v3312_v46 = vor.u32 %v4757_v37, %v3309_v38 }
  0x1d   :  { %v3499_v52 = vld [vmem:[#allocation2 + $0x260] sm:$0xf]  ;;  %v4807_v53 = vld [vmem:[#allocation2 + $0x26c] sm:$0xf0]  ;;  %v3372_v57 = vor.u32 %v4775_v51, %v3371_v49  ;;  %1473 = vmatpush.bf16.msra.mxu3 %v3644_v50  ;;  %v4753_v50 = vld [vmem:[#allocation2 + $0xc4] sm:$0xf] }
  0x1e   :  { %v3627_v54 = vld [vmem:[#allocation2 + $0x360] sm:$0xf]  ;;  %v4839_v55 = vld [vmem:[#allocation2 + $0x36c] sm:$0xf0]  ;;  %v3500_v58 = vor.u32 %v4807_v53, %v3499_v52  ;;  %1435 = vmatpush.bf16.msra.mxu0 %v3244_v56  ;;  %v3293_v51 = vld [vmem:[#allocation2 + $0xd0] sm:$0xf0] }
  0x1f   :  { %v3227_v59 = vld [vmem:[#allocation2 + $0x40] sm:$0xf]  ;;  %v4739_v60 = vld [vmem:[#allocation2 + $0x4c] sm:$0xf0]  ;;  %v3628_v62 = vor.u32 %v4839_v55, %v3627_v54  ;;  %1448 = vmatpush.bf16.msra.mxu1 %v3372_v57 }
  0x20   :  { %v3355_v61 = vld [vmem:[#allocation2 + $0x140] sm:$0xf]  ;;  %v4771_v63 = vld [vmem:[#allocation2 + $0x14c] sm:$0xf0]  ;;  %v3228_v4 = vor.u32 %v4739_v60, %v3227_v59  ;;  %1461 = vmatpush.bf16.msra.mxu2 %v3500_v58  ;;  %v3296_v59 = vor.u32 %v4753_v50, %v3293_v51 }
  0x21   :  { %v3483_v0 = vld [vmem:[#allocation2 + $0x240] sm:$0xf]  ;;  %v4803_v1 = vld [vmem:[#allocation2 + $0x24c] sm:$0xf0]  ;;  %v3356_v5 = vor.u32 %v4771_v63, %v3355_v61  ;;  %1474 = vmatpush.bf16.msra.mxu3 %v3628_v62 }
  0x22   :  { %v3611_v2 = vld [vmem:[#allocation2 + $0x340] sm:$0xf]  ;;  %v4835_v3 = vld [vmem:[#allocation2 + $0x34c] sm:$0xf0]  ;;  %v3484_v6 = vor.u32 %v4803_v1, %v3483_v0  ;;  %1436 = vmatpush.bf16.msra.mxu0 %v3228_v4  ;;  %v4749_v1 = vld [vmem:[#allocation2 + $0xa4] sm:$0xf] }
  0x23   :  { %v3211_v7 = vld [vmem:[#allocation2 + $0x20] sm:$0xf]  ;;  %v4735_v8 = vld [vmem:[#allocation2 + $0x2c] sm:$0xf0]  ;;  %v3612_v10 = vor.u32 %v4835_v3, %v3611_v2  ;;  %1449 = vmatpush.bf16.msra.mxu1 %v3356_v5  ;;  %v3277_v2 = vld [vmem:[#allocation2 + $0xb0] sm:$0xf0] }
  0x24   :  { %v3339_v9 = vld [vmem:[#allocation2 + $0x120] sm:$0xf]  ;;  %v4767_v11 = vld [vmem:[#allocation2 + $0x12c] sm:$0xf0]  ;;  %v3212_v16 = vor.u32 %v4735_v8, %v3211_v7  ;;  %1462 = vmatpush.bf16.msra.mxu2 %v3484_v6  ;;  %v58_v5 = vld [vmem:[%s5453_s0] sm:$0xff] }
  0x25   :  { %v3467_v12 = vld [vmem:[#allocation2 + $0x220] sm:$0xf]  ;;  %v4799_v13 = vld [vmem:[#allocation2 + $0x22c] sm:$0xf0]  ;;  %v3340_v19 = vor.u32 %v4767_v11, %v3339_v9  ;;  %1475 = vmatpush.bf16.msra.mxu3 %v3612_v10 }
  0x26   :  { %v3595_v14 = vld [vmem:[#allocation2 + $0x320] sm:$0xf]  ;;  %v4831_v15 = vld [vmem:[#allocation2 + $0x32c] sm:$0xf0]  ;;  %v3468_v20 = vor.u32 %v4799_v13, %v3467_v12  ;;  %1437 = vmatpush.bf16.msra.mxu0 %v3212_v16  ;;  %v290_v12 = vunpack.c.l.b16 %v58_v5  ;;  %v291_v13 = vunpack.c.h.b16 %v58_v5 }
  0x27   :  { %v3195_v17 = vld [vmem:[#allocation2] sm:$0xf]  ;;  %v4731_v18 = vld [vmem:[#allocation2 + $0xc] sm:$0xf0]  ;;  %v3596_v24 = vor.u32 %v4831_v15, %v3595_v14  ;;  %1450 = vmatpush.bf16.msra.mxu1 %v3340_v19  ;;  %v3280_v14 = vor.u32 %v4749_v1, %v3277_v2  ;;  %v3261_v19 = vld [vmem:[#allocation2 + $0x90] sm:$0xf0] }
  0x28   :  { %v3323_v21 = vld [vmem:[#allocation2 + $0x100] sm:$0xf]  ;;  %v4763_v22 = vld [vmem:[#allocation2 + $0x10c] sm:$0xf0]  ;;  %v3196_v31 = vor.u32 %v4731_v18, %v3195_v17  ;;  %1463 = vmatpush.bf16.msra.mxu2 %v3468_v20  ;;  %v4745_v18 = vld [vmem:[#allocation2 + $0x84] sm:$0xf]  ;;  %v5230_v20 = vpack.c.b16 %v290_v12, %v290_v12 }
  0x29   :  { %v3451_v23 = vld [vmem:[#allocation2 + $0x200] sm:$0xf]  ;;  %v4795_v25 = vld [vmem:[#allocation2 + $0x20c] sm:$0xf0]  ;;  %v3324_v35 = vor.u32 %v4763_v22, %v3323_v21  ;;  %1476 = vmatpush.bf16.msra.mxu3 %v3596_v24  ;;  %v5232_v21 = vpack.c.b16 %v291_v13, %v291_v13  ;;  %v4821_v12 = vld [vmem:[#allocation2 + $0x2e4] sm:$0xf] }
  0x2a   :  { %v3579_v26 = vld [vmem:[#allocation2 + $0x300] sm:$0xf]  ;;  %v4827_v27 = vld [vmem:[#allocation2 + $0x30c] sm:$0xf0]  ;;  %v3452_v36 = vor.u32 %v4795_v25, %v3451_v23  ;;  %1438 = vmatpush.bf16.msra.mxu0 %v3196_v31 }
  0x2b   :  { %v3819_v28 = vld [vmem:[#allocation2 + $0x4e0] sm:$0xf]  ;;  %v4887_v29 = vld [vmem:[#allocation2 + $0x4ec] sm:$0xf0]  ;;  %v3580_v39 = vor.u32 %v4827_v27, %v3579_v26  ;;  %1451 = vmatpush.bf16.msra.mxu1 %v3324_v35 }
  0x2c   :  { %v3947_v30 = vld [vmem:[#allocation2 + $0x5e0] sm:$0xf]  ;;  %v4919_v32 = vld [vmem:[#allocation2 + $0x5ec] sm:$0xf0]  ;;  %v3820_v40 = vor.u32 %v4887_v29, %v3819_v28  ;;  %1464 = vmatpush.bf16.msra.mxu2 %v3452_v36  ;;  %v3264_v28 = vor.u32 %v4745_v18, %v3261_v19 }
  0x2d   :  { %v4075_v33 = vld [vmem:[#allocation2 + $0x6e0] sm:$0xf]  ;;  %v4951_v34 = vld [vmem:[#allocation2 + $0x6ec] sm:$0xf0]  ;;  %v3948_v41 = vor.u32 %v4919_v32, %v3947_v30  ;;  %1477 = vmatpush.bf16.msra.mxu3 %v3580_v39  ;;  %1439 = vmatmul.bf16.vlgmr.msra.gmra.mxu0 %v5230_v20  ;;  %v4741_v32 = vld [vmem:[#allocation2 + $0x64] sm:$0xf] }
  0x2e   :  { %v4076_v42 = vor.u32 %v4951_v34, %v4075_v33  ;;  %v3803_v43 = vld [vmem:[#allocation2 + $0x4c0] sm:$0xf]  ;;  %v4883_v44 = vld [vmem:[#allocation2 + $0x4cc] sm:$0xf0]  ;;  %1483 = vmatpush.bf16.msrb.mxu0 %v3820_v40  ;;  %v3245_v33 = vld [vmem:[#allocation2 + $0x70] sm:$0xf0]  ;;  %1452 = vmatmul.bf16.vlgmr.msra.gmra.mxu1 %v5232_v21 }
  0x2f   :  { %v3931_v45 = vld [vmem:[#allocation2 + $0x5c0] sm:$0xf]  ;;  %v4915_v47 = vld [vmem:[#allocation2 + $0x5cc] sm:$0xf0]  ;;  %v3804_v52 = vor.u32 %v4883_v44, %v3803_v43  ;;  %1496 = vmatpush.bf16.msrb.mxu1 %v3948_v41  ;;  %v3248_v40 = vor.u32 %v4741_v32, %v3245_v33  ;;  %v4737_v44 = vld [vmem:[#allocation2 + $0x44] sm:$0xf] }
  0x30   :  { %v4059_v48 = vld [vmem:[#allocation2 + $0x6c0] sm:$0xf]  ;;  %v4947_v49 = vld [vmem:[#allocation2 + $0x6cc] sm:$0xf0]  ;;  %1509 = vmatpush.bf16.msrb.mxu2 %v4076_v42  ;;  %v3932_v54 = vor.u32 %v4915_v47, %v3931_v45  ;;  %v3229_v45 = vld [vmem:[#allocation2 + $0x50] sm:$0xf0] }
  0x31   :  { %v3787_v53 = vld [vmem:[#allocation2 + $0x4a0] sm:$0xf]  ;;  %v4060_v55 = vor.u32 %v4947_v49, %v4059_v48  ;;  %v4879_v56 = vld [vmem:[#allocation2 + $0x4ac] sm:$0xf0]  ;;  %1522 = vmatpush.bf16.msrb.mxu3 %v3312_v46  ;;  %v4817_v32 = vld [vmem:[#allocation2 + $0x2c4] sm:$0xf] }
  0x32   :  { %v3915_v57 = vld [vmem:[#allocation2 + $0x5a0] sm:$0xf]  ;;  %v4911_v60 = vld [vmem:[#allocation2 + $0x5ac] sm:$0xf0]  ;;  %1484 = vmatpush.bf16.msrb.mxu0 %v3804_v52  ;;  %v3788_v3 = vor.u32 %v4879_v56, %v3787_v53  ;;  %v3232_v52 = vor.u32 %v4737_v44, %v3229_v45  ;;  %v4733_v56 = vld [vmem:[#allocation2 + $0x24] sm:$0xf] }
  0x33   :  { %v59_v58 = vld [vmem:[%s5453_s0 + $0x8] sm:$0xff]  ;;  %v4943_v62 = vld [vmem:[#allocation2 + $0x6ac] sm:$0xf0]  ;;  %1497 = vmatpush.bf16.msrb.mxu1 %v3932_v54  ;;  %v3916_v7 = vor.u32 %v4911_v60, %v3915_v57  ;;  %v3213_v57 = vld [vmem:[#allocation2 + $0x30] sm:$0xf0] }
  0x34   :  { %v4043_v61 = vld [vmem:[#allocation2 + $0x6a0] sm:$0xf]  ;;  %v292_v63 = vunpack.c.l.b16 %v59_v58  ;;  %v293_v0 = vunpack.c.h.b16 %v59_v58  ;;  %1510 = vmatpush.bf16.msrb.mxu2 %v4060_v55  ;;  %v4875_v10 = vld [vmem:[#allocation2 + $0x48c] sm:$0xf0]  ;;  %v3216_v5 = vor.u32 %v4733_v56, %v3213_v57  ;;  %v4781_v45 = vld [vmem:[#allocation2 + $0x1a4] sm:$0xf] }
  0x35   :  { %v4044_v8 = vor.u32 %v4943_v62, %v4043_v61  ;;  %v3771_v9 = vld [vmem:[#allocation2 + $0x480] sm:$0xf]  ;;  %1523 = vmatpush.bf16.msrb.mxu3 %v3296_v59  ;;  %v4907_v15 = vld [vmem:[#allocation2 + $0x58c] sm:$0xf0]  ;;  %v4777_v57 = vld [vmem:[#allocation2 + $0x184] sm:$0xf] }
  0x36   :  { %v5222_v4 = vpack.c.b16 %v292_v63, %v292_v63  ;;  %v5227_v6 = vpack.c.b16 %v293_v0, %v293_v0  ;;  %v3899_v11 = vld [vmem:[#allocation2 + $0x580] sm:$0xf]  ;;  %v4939_v17 = vld [vmem:[#allocation2 + $0x68c] sm:$0xf0]  ;;  %1485 = vmatpush.bf16.msrb.mxu0 %v3788_v3  ;;  %v3772_v22 = vor.u32 %v4875_v10, %v3771_v9  ;;  %v60_v9 = vld [vmem:[%s5453_s0 + $0x10] sm:$0xff] }
  0x37   :  { %v4027_v16 = vld [vmem:[#allocation2 + $0x680] sm:$0xf]  ;;  %1498 = vmatpush.bf16.msrb.mxu1 %v3916_v7  ;;  %v3900_v23 = vor.u32 %v4907_v15, %v3899_v11  ;;  %v4871_v26 = vld [vmem:[#allocation2 + $0x46c] sm:$0xf0]  ;;  %v4729_v7 = vld [vmem:[#allocation2 + $0x4] sm:$0xf] }
  0x38   :  { %1465 = vmatmul.bf16.vlgmr.msra.gmra.mxu2 %v5222_v4  ;;  %1478 = vmatmul.bf16.vlgmr.msra.gmra.mxu3 %v5227_v6  ;;  %v4028_v24 = vor.u32 %v4939_v17, %v4027_v16  ;;  %v3755_v25 = vld [vmem:[#allocation2 + $0x460] sm:$0xf]  ;;  %v4903_v29 = vld [vmem:[#allocation2 + $0x56c] sm:$0xf0]  ;;  %v4789_v10 = vld [vmem:[#allocation2 + $0x1e4] sm:$0xf] }
  0x39   :  { %1511 = vmatpush.bf16.msrb.mxu2 %v4044_v8  ;;  %v3883_v27 = vld [vmem:[#allocation2 + $0x560] sm:$0xf]  ;;  %1524 = vmatpush.bf16.msrb.mxu3 %v3280_v14  ;;  %v4935_v31 = vld [vmem:[#allocation2 + $0x66c] sm:$0xf0]  ;;  %v3756_v34 = vor.u32 %v4871_v26, %v3755_v25  ;;  %v3197_v8 = vld [vmem:[#allocation2 + $0x10] sm:$0xf0]  ;;  %v295_v25 = vunpack.c.h.b16 %v60_v9 }
  0x3a   :  { %v4011_v30 = vld [vmem:[#allocation2 + $0x660] sm:$0xf]  ;;  %1486 = vmatpush.bf16.msrb.mxu0 %v3772_v22  ;;  %v3884_v35 = vor.u32 %v4903_v29, %v3883_v27  ;;  %v4867_v38 = vld [vmem:[#allocation2 + $0x44c] sm:$0xf0]  ;;  %v3437_v11 = vld [vmem:[#allocation2 + $0x1f0] sm:$0xf0]  ;;  %v3200_v26 = vor.u32 %v4729_v7, %v3197_v8 }
  0x3b   :  { %1499 = vmatpush.bf16.msrb.mxu1 %v3900_v23  ;;  %v4012_v36 = vor.u32 %v4935_v31, %v4011_v30  ;;  %v3739_v37 = vld [vmem:[#allocation2 + $0x440] sm:$0xf]  ;;  %v4899_v41 = vld [vmem:[#allocation2 + $0x54c] sm:$0xf0]  ;;  %v3565_v14 = vld [vmem:[#allocation2 + $0x2f0] sm:$0xf0]  ;;  %v3440_v27 = vor.u32 %v4789_v10, %v3437_v11 }
  0x3c   :  { %v3867_v39 = vld [vmem:[#allocation2 + $0x540] sm:$0xf]  ;;  %v4931_v43 = vld [vmem:[#allocation2 + $0x64c] sm:$0xf0]  ;;  %v3740_v46 = vor.u32 %v4867_v38, %v3739_v37  ;;  %v4853_v15 = vld [vmem:[#allocation2 + $0x3e4] sm:$0xf] }
  0x3d   :  { %1512 = vmatpush.bf16.msrb.mxu2 %v4028_v24  ;;  %1525 = vmatpush.bf16.msrb.mxu3 %v3264_v28  ;;  %v3995_v42 = vld [vmem:[#allocation2 + $0x640] sm:$0xf]  ;;  %v3868_v47 = vor.u32 %v4899_v41, %v3867_v39  ;;  %v4863_v50 = vld [vmem:[#allocation2 + $0x42c] sm:$0xf0]  ;;  %v3693_v16 = vld [vmem:[#allocation2 + $0x3f0] sm:$0xf0]  ;;  %v294_v24 = vunpack.c.l.b16 %v60_v9  ;;  %v3568_v28 = vor.u32 %v4821_v12, %v3565_v14  ;;  %v5247_v41 = vpack.c.b16 %v295_v25, %v295_v25 }
  0x3e   :  { %1487 = vmatpush.bf16.msrb.mxu0 %v3756_v34  ;;  %v3996_v48 = vor.u32 %v4931_v43, %v3995_v42  ;;  %v3723_v49 = vld [vmem:[#allocation2 + $0x420] sm:$0xf]  ;;  %v4895_v53 = vld [vmem:[#allocation2 + $0x52c] sm:$0xf0]  ;;  %v4885_v22 = vld [vmem:[#allocation2 + $0x4e4] sm:$0xf]  ;;  %v3696_v29 = vor.u32 %v4853_v15, %v3693_v16 }
  0x3f   :  { %1500 = vmatpush.bf16.msrb.mxu1 %v3884_v35  ;;  %v3851_v51 = vld [vmem:[#allocation2 + $0x520] sm:$0xf]  ;;  %v4927_v55 = vld [vmem:[#allocation2 + $0x62c] sm:$0xf0]  ;;  %v3724_v59 = vor.u32 %v4863_v50, %v3723_v49  ;;  %v3821_v23 = vld [vmem:[#allocation2 + $0x4f0] sm:$0xf0] }
  0x40   :  { %v3979_v54 = vld [vmem:[#allocation2 + $0x620] sm:$0xf]  ;;  %v4859_v60 = vld [vmem:[#allocation2 + $0x40c] sm:$0xf0]  ;;  %v3852_v63 = vor.u32 %v4895_v53, %v3851_v51  ;;  %v4785_v30 = vld [vmem:[#allocation2 + $0x1c4] sm:$0xf]  ;;  %v3824_v33 = vor.u32 %v4885_v22, %v3821_v23 }
  0x41   :  { %1513 = vmatpush.bf16.msrb.mxu2 %v4012_v36  ;;  %1526 = vmatpush.bf16.msrb.mxu3 %v3248_v40  ;;  %v3707_v58 = vld [vmem:[#allocation2 + $0x400] sm:$0xf]  ;;  %v4891_v62 = vld [vmem:[#allocation2 + $0x50c] sm:$0xf0]  ;;  %v3980_v0 = vor.u32 %v4927_v55, %v3979_v54  ;;  %v3421_v31 = vld [vmem:[#allocation2 + $0x1d0] sm:$0xf0]  ;;  %v5245_v40 = vpack.c.b16 %v294_v24, %v294_v24 }
  0x42   :  { %1488 = vmatpush.bf16.msrb.mxu0 %v3740_v46  ;;  %v3835_v61 = vld [vmem:[#allocation2 + $0x500] sm:$0xf]  ;;  %v4923_v2 = vld [vmem:[#allocation2 + $0x60c] sm:$0xf0]  ;;  %v3708_v13 = vor.u32 %v4859_v60, %v3707_v58  ;;  %v3549_v34 = vld [vmem:[#allocation2 + $0x2d0] sm:$0xf0]  ;;  %v3424_v42 = vor.u32 %v4785_v30, %v3421_v31 }
  0x43   :  { %1501 = vmatpush.bf16.msrb.mxu1 %v3868_v47  ;;  %v3963_v1 = vld [vmem:[#allocation2 + $0x600] sm:$0xf]  ;;  %v61_v3 = vld [vmem:[%s5453_s0 + $0x18] sm:$0xf]  ;;  %v3836_v18 = vor.u32 %v4891_v62, %v3835_v61  ;;  %v4849_v35 = vld [vmem:[#allocation2 + $0x3c4] sm:$0xf]  ;;  %v3552_v43 = vor.u32 %v4817_v32, %v3549_v34 }
  0x44   :  { %v296_v17 = vunpack.c.l.b16 %v61_v3  ;;  %v3964_v19 = vor.u32 %v4923_v2, %v3963_v1  ;;  %v3677_v36 = vld [vmem:[#allocation2 + $0x3d0] sm:$0xf0]  ;;  %v4881_v38 = vld [vmem:[#allocation2 + $0x4c4] sm:$0xf] }
  0x45   :  { %1514 = vmatpush.bf16.msrb.mxu2 %v3996_v48  ;;  %1527 = vmatpush.bf16.msrb.mxu3 %v3232_v52  ;;  %v3805_v39 = vld [vmem:[#allocation2 + $0x4d0] sm:$0xf0]  ;;  %v3680_v44 = vor.u32 %v4849_v35, %v3677_v36  ;;  %v4813_v47 = vld [vmem:[#allocation2 + $0x2a4] sm:$0xf] }
  0x46   :  { %1489 = vmatpush.bf16.msrb.mxu0 %v3724_v59  ;;  %v5243_v37 = vpack.c.b16 %v296_v17, %v296_v17  ;;  %v3405_v46 = vld [vmem:[#allocation2 + $0x1b0] sm:$0xf0]  ;;  %v3808_v48 = vor.u32 %v4881_v38, %v3805_v39  ;;  %v4845_v50 = vld [vmem:[#allocation2 + $0x3a4] sm:$0xf] }
  0x47   :  { %1502 = vmatpush.bf16.msrb.mxu1 %v3852_v63  ;;  %v3533_v49 = vld [vmem:[#allocation2 + $0x2b0] sm:$0xf0]  ;;  %v4877_v52 = vld [vmem:[#allocation2 + $0x4a4] sm:$0xf]  ;;  %v3408_v54 = vor.u32 %v4781_v45, %v3405_v46 }
  0x48   :  { %v3661_v51 = vld [vmem:[#allocation2 + $0x3b0] sm:$0xf0]  ;;  %v3536_v55 = vor.u32 %v4813_v47, %v3533_v49  ;;  %v4809_v59 = vld [vmem:[#allocation2 + $0x284] sm:$0xf] }
  0x49   :  { %1515 = vmatpush.bf16.msrb.mxu2 %v3980_v0  ;;  %1528 = vmatpush.bf16.msrb.mxu3 %v3216_v5  ;;  %v3789_v53 = vld [vmem:[#allocation2 + $0x4b0] sm:$0xf0]  ;;  %v3664_v56 = vor.u32 %v4845_v50, %v3661_v51  ;;  %v4841_v62 = vld [vmem:[#allocation2 + $0x384] sm:$0xf] }
  0x4a   :  { %1490 = vmatpush.bf16.msrb.mxu0 %v3708_v13  ;;  %v3389_v58 = vld [vmem:[#allocation2 + $0x190] sm:$0xf0]  ;;  %v3792_v60 = vor.u32 %v4877_v52, %v3789_v53  ;;  %v4873_v0 = vld [vmem:[#allocation2 + $0x484] sm:$0xf] }
  0x4b   :  { %1503 = vmatpush.bf16.msrb.mxu1 %v3836_v18  ;;  %v3517_v61 = vld [vmem:[#allocation2 + $0x290] sm:$0xf0]  ;;  %v3392_v2 = vor.u32 %v4777_v57, %v3389_v58  ;;  %v4773_v7 = vld [vmem:[#allocation2 + $0x164] sm:$0xf] }
  0x4c   :  { %v3645_v63 = vld [vmem:[#allocation2 + $0x390] sm:$0xf0]  ;;  %v3520_v3 = vor.u32 %v4809_v59, %v3517_v61  ;;  %v4805_v9 = vld [vmem:[#allocation2 + $0x264] sm:$0xf] }
  0x4d   :  { %1516 = vmatpush.bf16.msrb.mxu2 %v3964_v19  ;;  %1529 = vmatpush.bf16.msrb.mxu3 %v3200_v26  ;;  %v3773_v1 = vld [vmem:[#allocation2 + $0x490] sm:$0xf0]  ;;  %v3648_v5 = vor.u32 %v4841_v62, %v3645_v63  ;;  %v4837_v12 = vld [vmem:[#allocation2 + $0x364] sm:$0xf]  ;;  %v3315_v62 = vld [vmem:[#allocation2 + $0xe8] sm:$0xf] }
  0x4e   :  { %1535 = vmatpush.bf16.msra.mxu0 %v3440_v27  ;;  %1504 = vmatmul.bf16.vlgmr.msrb.gmra.mxu1 %v5247_v41  ;;  %v3373_v8 = vld [vmem:[#allocation2 + $0x170] sm:$0xf0]  ;;  %v3776_v10 = vor.u32 %v4873_v0, %v3773_v1  ;;  %v4869_v14 = vld [vmem:[#allocation2 + $0x464] sm:$0xf]  ;;  %v4760_v63 = vld [vmem:[#allocation2 + $0xf4] sm:$0xf0] }
  0x4f   :  { %1548 = vmatpush.bf16.msra.mxu1 %v3568_v28  ;;  %1491 = vmatmul.bf16.vlgmr.msrb.gmra.mxu0 %v5245_v40  ;;  %v3501_v11 = vld [vmem:[#allocation2 + $0x270] sm:$0xf0]  ;;  %v3376_v16 = vor.u32 %v4773_v7, %v3373_v8  ;;  %v4769_v19 = vld [vmem:[#allocation2 + $0x144] sm:$0xf] }
  0x50   :  { %1517 = vmatmul.bf16.vlgmr.msrb.gmra.mxu2 %v5243_v37  ;;  %1530 = vmatmul.bf16.vlgmr.msrb.gmra.mxu3 %v5230_v20  ;;  %v3629_v13 = vld [vmem:[#allocation2 + $0x370] sm:$0xf0]  ;;  %v3504_v17 = vor.u32 %v4805_v9, %v3501_v11  ;;  %v4801_v23 = vld [vmem:[#allocation2 + $0x244] sm:$0xf]  ;;  %v3316_v9 = vor.u32 %v4760_v63, %v3315_v62 }
  0x51   :  { %1561 = vmatpush.bf16.msra.mxu2 %v3696_v29  ;;  %1574 = vmatpush.bf16.msra.mxu3 %v3824_v33  ;;  %v3757_v15 = vld [vmem:[#allocation2 + $0x470] sm:$0xf0]  ;;  %v3632_v18 = vor.u32 %v4837_v12, %v3629_v13  ;;  %v4833_v26 = vld [vmem:[#allocation2 + $0x344] sm:$0xf] }
  0x52   :  { %1536 = vmatpush.bf16.msra.mxu0 %v3424_v42  ;;  %v3357_v22 = vld [vmem:[#allocation2 + $0x150] sm:$0xf0]  ;;  %v3760_v24 = vor.u32 %v4869_v14, %v3757_v15  ;;  %v4865_v28 = vld [vmem:[#allocation2 + $0x444] sm:$0xf]  ;;  %v3299_v15 = vld [vmem:[#allocation2 + $0xc8] sm:$0xf] }
  0x53   :  { %1549 = vmatpush.bf16.msra.mxu1 %v3552_v43  ;;  %v3485_v25 = vld [vmem:[#allocation2 + $0x250] sm:$0xf0]  ;;  %v3360_v30 = vor.u32 %v4769_v19, %v3357_v22  ;;  %v4765_v33 = vld [vmem:[#allocation2 + $0x124] sm:$0xf] }
  0x54   :  { %v3613_v27 = vld [vmem:[#allocation2 + $0x350] sm:$0xf0]  ;;  %v3488_v31 = vor.u32 %v4801_v23, %v3485_v25  ;;  %v4797_v35 = vld [vmem:[#allocation2 + $0x224] sm:$0xf] }
  0x55   :  { %1562 = vmatpush.bf16.msra.mxu2 %v3680_v44  ;;  %1575 = vmatpush.bf16.msra.mxu3 %v3808_v48  ;;  %v3741_v29 = vld [vmem:[#allocation2 + $0x450] sm:$0xf0]  ;;  %v3616_v32 = vor.u32 %v4833_v26, %v3613_v27  ;;  %v4829_v39 = vld [vmem:[#allocation2 + $0x324] sm:$0xf] }
  0x56   :  { %1537 = vmatpush.bf16.msra.mxu0 %v3408_v54  ;;  %v3341_v34 = vld [vmem:[#allocation2 + $0x130] sm:$0xf0]  ;;  %v3744_v36 = vor.u32 %v4865_v28, %v3741_v29  ;;  %v4861_v43 = vld [vmem:[#allocation2 + $0x424] sm:$0xf]  ;;  %v3283_v29 = vld [vmem:[#allocation2 + $0xa8] sm:$0xf] }
  0x57   :  { %1550 = vmatpush.bf16.msra.mxu1 %v3536_v55  ;;  %v3469_v38 = vld [vmem:[#allocation2 + $0x230] sm:$0xf0]  ;;  %v3344_v45 = vor.u32 %v4765_v33, %v3341_v34  ;;  %v4761_v46 = vld [vmem:[#allocation2 + $0x104] sm:$0xf] }
  0x58   :  { %v3597_v42 = vld [vmem:[#allocation2 + $0x330] sm:$0xf0]  ;;  %v3472_v48 = vor.u32 %v4797_v35, %v3469_v38  ;;  %v4793_v50 = vld [vmem:[#allocation2 + $0x204] sm:$0xf] }
  0x59   :  { %1563 = vmatpush.bf16.msra.mxu2 %v3664_v56  ;;  %1576 = vmatpush.bf16.msra.mxu3 %v3792_v60  ;;  %v3725_v44 = vld [vmem:[#allocation2 + $0x430] sm:$0xf0]  ;;  %v3600_v49 = vor.u32 %v4829_v39, %v3597_v42  ;;  %v4825_v52 = vld [vmem:[#allocation2 + $0x304] sm:$0xf] }
  0x5a   :  { %1538 = vmatpush.bf16.msra.mxu0 %v3392_v2  ;;  %v3325_v47 = vld [vmem:[#allocation2 + $0x110] sm:$0xf0]  ;;  %v3728_v53 = vor.u32 %v4861_v43, %v3725_v44  ;;  %v4857_v55 = vld [vmem:[#allocation2 + $0x404] sm:$0xf]  ;;  %v3443_v2 = vld [vmem:[#allocation2 + $0x1e8] sm:$0xf] }
  0x5b   :  { %1551 = vmatpush.bf16.msra.mxu1 %v3520_v3  ;;  %v3453_v51 = vld [vmem:[#allocation2 + $0x210] sm:$0xf0]  ;;  %v4917_v57 = vld [vmem:[#allocation2 + $0x5e4] sm:$0xf]  ;;  %v3328_v60 = vor.u32 %v4761_v46, %v3325_v47  ;;  %v4792_v3 = vld [vmem:[#allocation2 + $0x1f4] sm:$0xf0] }
  0x5c   :  { %v3581_v54 = vld [vmem:[#allocation2 + $0x310] sm:$0xf0]  ;;  %v4949_v59 = vld [vmem:[#allocation2 + $0x6e4] sm:$0xf]  ;;  %v3456_v0 = vor.u32 %v4793_v50, %v3453_v51  ;;  %v3444_v13 = vor.u32 %v4792_v3, %v3443_v2  ;;  %v3267_v44 = vld [vmem:[#allocation2 + $0x88] sm:$0xf] }
  0x5d   :  { %1564 = vmatpush.bf16.msra.mxu2 %v3648_v5  ;;  %1577 = vmatpush.bf16.msra.mxu3 %v3776_v10  ;;  %v3709_v56 = vld [vmem:[#allocation2 + $0x410] sm:$0xf0]  ;;  %v3584_v1 = vor.u32 %v4825_v52, %v3581_v54  ;;  %v4913_v10 = vld [vmem:[#allocation2 + $0x5c4] sm:$0xf]  ;;  %v3395_v46 = vld [vmem:[#allocation2 + $0x188] sm:$0xf] }
  0x5e   :  { %1539 = vmatpush.bf16.msra.mxu0 %v3376_v16  ;;  %v3949_v58 = vld [vmem:[#allocation2 + $0x5f0] sm:$0xf0]  ;;  %v3712_v5 = vor.u32 %v4857_v55, %v3709_v56  ;;  %v4945_v12 = vld [vmem:[#allocation2 + $0x6c4] sm:$0xf]  ;;  %v4756_v16 = vld [vmem:[#allocation2 + $0xd4] sm:$0xf0] }
  0x5f   :  { %1552 = vmatpush.bf16.msra.mxu1 %v3504_v17  ;;  %v4077_v61 = vld [vmem:[#allocation2 + $0x6f0] sm:$0xf0]  ;;  %v3952_v7 = vor.u32 %v4917_v57, %v3949_v58  ;;  %v3427_v17 = vld [vmem:[#allocation2 + $0x1c8] sm:$0xf]  ;;  %v3300_v23 = vor.u32 %v4756_v16, %v3299_v15  ;;  %v4941_v26 = vld [vmem:[#allocation2 + $0x6a4] sm:$0xf] }
  0x60   :  { %v4080_v8 = vor.u32 %v4949_v59, %v4077_v61  ;;  %v3933_v11 = vld [vmem:[#allocation2 + $0x5d0] sm:$0xf0]  ;;  %v4937_v39 = vld [vmem:[#allocation2 + $0x684] sm:$0xf]  ;;  %v4780_v47 = vld [vmem:[#allocation2 + $0x194] sm:$0xf0] }
  0x61   :  { %1565 = vmatpush.bf16.msra.mxu2 %v3632_v18  ;;  %1578 = vmatpush.bf16.msra.mxu3 %v3760_v24  ;;  %v4061_v14 = vld [vmem:[#allocation2 + $0x6d0] sm:$0xf0]  ;;  %v4788_v18 = vld [vmem:[#allocation2 + $0x1d4] sm:$0xf0]  ;;  %v3936_v19 = vor.u32 %v4913_v10, %v3933_v11  ;;  %v4909_v24 = vld [vmem:[#allocation2 + $0x5a4] sm:$0xf]  ;;  %v3396_v54 = vor.u32 %v4780_v47, %v3395_v46 }
  0x62   :  { %1540 = vmatpush.bf16.msra.mxu0 %v3360_v30  ;;  %v4064_v22 = vor.u32 %v4945_v12, %v4061_v14  ;;  %v3917_v25 = vld [vmem:[#allocation2 + $0x5b0] sm:$0xf0]  ;;  %v3428_v27 = vor.u32 %v4788_v18, %v3427_v17  ;;  %v4752_v30 = vld [vmem:[#allocation2 + $0xb4] sm:$0xf0]  ;;  %v4901_v51 = vld [vmem:[#allocation2 + $0x564] sm:$0xf] }
  0x63   :  { %1553 = vmatpush.bf16.msra.mxu1 %v3488_v31  ;;  %v4045_v28 = vld [vmem:[#allocation2 + $0x6b0] sm:$0xf0]  ;;  %v3411_v31 = vld [vmem:[#allocation2 + $0x1a8] sm:$0xf]  ;;  %v3920_v33 = vor.u32 %v4909_v24, %v3917_v25  ;;  %v3284_v35 = vor.u32 %v4752_v30, %v3283_v29  ;;  %v4744_v57 = vld [vmem:[#allocation2 + $0x74] sm:$0xf0] }
  0x64   :  { %v4048_v34 = vor.u32 %v4941_v26, %v4045_v28  ;;  %v3901_v38 = vld [vmem:[#allocation2 + $0x590] sm:$0xf0]  ;;  %v3251_v56 = vld [vmem:[#allocation2 + $0x68] sm:$0xf]  ;;  %v4776_v59 = vld [vmem:[#allocation2 + $0x174] sm:$0xf0] }
  0x65   :  { %1566 = vmatpush.bf16.msra.mxu2 %v3616_v32  ;;  %1579 = vmatpush.bf16.msra.mxu3 %v3744_v36  ;;  %v4784_v32 = vld [vmem:[#allocation2 + $0x1b4] sm:$0xf0]  ;;  %v4905_v36 = vld [vmem:[#allocation2 + $0x584] sm:$0xf]  ;;  %v4029_v43 = vld [vmem:[#allocation2 + $0x690] sm:$0xf0]  ;;  %v3252_v62 = vor.u32 %v4744_v57, %v3251_v56 }
  0x66   :  { %1541 = vmatpush.bf16.msra.mxu0 %v3344_v45  ;;  %v3412_v42 = vor.u32 %v4784_v32, %v3411_v31  ;;  %v4748_v45 = vld [vmem:[#allocation2 + $0x94] sm:$0xf0]  ;;  %v3885_v52 = vld [vmem:[#allocation2 + $0x570] sm:$0xf0]  ;;  %v3379_v58 = vld [vmem:[#allocation2 + $0x168] sm:$0xf] }
  0x67   :  { %1554 = vmatpush.bf16.msra.mxu1 %v3472_v48  ;;  %v3904_v48 = vor.u32 %v4905_v36, %v3901_v38  ;;  %v3268_v50 = vor.u32 %v4748_v45, %v3267_v44  ;;  %v4013_v55 = vld [vmem:[#allocation2 + $0x670] sm:$0xf0]  ;;  %v4897_v63 = vld [vmem:[#allocation2 + $0x544] sm:$0xf]  ;;  %v3380_v2 = vor.u32 %v4776_v59, %v3379_v58  ;;  %v3219_v18 = vld [vmem:[#allocation2 + $0x28] sm:$0xf] }
  0x68   :  { %v3997_v3 = vld [vmem:[#allocation2 + $0x650] sm:$0xf0]  ;;  %v4925_v15 = vld [vmem:[#allocation2 + $0x624] sm:$0xf]  ;;  %v3203_v31 = vld [vmem:[#allocation2 + $0x8] sm:$0xf] }
  0x69   :  { %1567 = vmatpush.bf16.msra.mxu2 %v3600_v49  ;;  %1580 = vmatpush.bf16.msra.mxu3 %v3728_v53  ;;  %v4032_v49 = vor.u32 %v4937_v39, %v4029_v43  ;;  %v4933_v53 = vld [vmem:[#allocation2 + $0x664] sm:$0xf]  ;;  %v3853_v14 = vld [vmem:[#allocation2 + $0x530] sm:$0xf0]  ;;  %v3571_v36 = vld [vmem:[#allocation2 + $0x2e8] sm:$0xf] }
  0x6a   :  { %1542 = vmatpush.bf16.msra.mxu0 %v3328_v60  ;;  %v3888_v60 = vor.u32 %v4901_v51, %v3885_v52  ;;  %v4016_v61 = vor.u32 %v4933_v53, %v4013_v55  ;;  %v3981_v17 = vld [vmem:[#allocation2 + $0x630] sm:$0xf0]  ;;  %v4889_v25 = vld [vmem:[#allocation2 + $0x504] sm:$0xf]  ;;  %v4824_v38 = vld [vmem:[#allocation2 + $0x2f4] sm:$0xf0] }
  0x6b   :  { %1555 = vmatpush.bf16.msra.mxu1 %v3456_v0  ;;  %v3869_v0 = vld [vmem:[#allocation2 + $0x550] sm:$0xf0]  ;;  %v4921_v29 = vld [vmem:[#allocation2 + $0x604] sm:$0xf]  ;;  %v3699_v39 = vld [vmem:[#allocation2 + $0x3e8] sm:$0xf]  ;;  %v3572_v51 = vor.u32 %v4824_v38, %v3571_v36 }
  0x6c   :  { %v3872_v10 = vor.u32 %v4897_v63, %v3869_v0  ;;  %v3837_v26 = vld [vmem:[#allocation2 + $0x510] sm:$0xf0]  ;;  %v4856_v43 = vld [vmem:[#allocation2 + $0x3f4] sm:$0xf0]  ;;  %v3827_v44 = vld [vmem:[#allocation2 + $0x4e8] sm:$0xf] }
  0x6d   :  { %1568 = vmatpush.bf16.msra.mxu2 %v3584_v1  ;;  %1581 = vmatpush.bf16.msra.mxu3 %v3712_v5  ;;  %v4929_v1 = vld [vmem:[#allocation2 + $0x644] sm:$0xf]  ;;  %v3235_v5 = vld [vmem:[#allocation2 + $0x48] sm:$0xf]  ;;  %v3965_v30 = vld [vmem:[#allocation2 + $0x610] sm:$0xf0]  ;;  %v3700_v52 = vor.u32 %v4856_v43, %v3699_v39 }
  0x6e   :  { %1587 = vmatpush.bf16.msrb.mxu0 %v3952_v7  ;;  %1556 = vmatmul.bf16.vlgmr.msra.gmra.mxu1 %v5222_v4  ;;  %v4740_v7 = vld [vmem:[#allocation2 + $0x54] sm:$0xf0]  ;;  %v4000_v11 = vor.u32 %v4929_v1, %v3997_v3  ;;  %v3968_v46 = vor.u32 %v4921_v29, %v3965_v30  ;;  %v3683_v56 = vld [vmem:[#allocation2 + $0x3c8] sm:$0xf] }
  0x6f   :  { %1600 = vmatpush.bf16.msrb.mxu1 %v4080_v8  ;;  %1543 = vmatmul.bf16.vlgmr.msra.gmra.mxu0 %v5232_v21  ;;  %v3363_v8 = vld [vmem:[#allocation2 + $0x148] sm:$0xf]  ;;  %v3236_v12 = vor.u32 %v4740_v7, %v3235_v5  ;;  %v4888_v45 = vld [vmem:[#allocation2 + $0x4f4] sm:$0xf0] }
  0x70   :  { %1569 = vmatmul.bf16.vlgmr.msra.gmra.mxu2 %v5227_v6  ;;  %1582 = vmatmul.bf16.vlgmr.msra.gmra.mxu3 %v5245_v40  ;;  %v3828_v53 = vor.u32 %v4888_v45, %v3827_v44  ;;  %v4820_v55 = vld [vmem:[#allocation2 + $0x2d4] sm:$0xf0]  ;;  %v3811_v59 = vld [vmem:[#allocation2 + $0x4c8] sm:$0xf] }
  0x71   :  { %1613 = vmatpush.bf16.msrb.mxu2 %v3316_v9  ;;  %1626 = vmatpush.bf16.msrb.mxu3 %v3444_v13  ;;  %v4772_v9 = vld [vmem:[#allocation2 + $0x154] sm:$0xf0]  ;;  %v4893_v13 = vld [vmem:[#allocation2 + $0x524] sm:$0xf]  ;;  %v3667_v5 = vld [vmem:[#allocation2 + $0x3a8] sm:$0xf] }
  0x72   :  { %1588 = vmatpush.bf16.msrb.mxu0 %v3936_v19  ;;  %v3364_v16 = vor.u32 %v4772_v9, %v3363_v8  ;;  %v4736_v19 = vld [vmem:[#allocation2 + $0x34] sm:$0xf0]  ;;  %v3856_v24 = vor.u32 %v4893_v13, %v3853_v14  ;;  %v3795_v9 = vld [vmem:[#allocation2 + $0x4a8] sm:$0xf] }
  0x73   :  { %1601 = vmatpush.bf16.msrb.mxu1 %v4064_v22  ;;  %v3347_v22 = vld [vmem:[#allocation2 + $0x128] sm:$0xf]  ;;  %v3220_v28 = vor.u32 %v4736_v19, %v3219_v18  ;;  %v4852_v58 = vld [vmem:[#allocation2 + $0x3d4] sm:$0xf0] }
  0x74   :  { %v3684_v0 = vor.u32 %v4852_v58, %v3683_v56  ;;  %v4816_v3 = vld [vmem:[#allocation2 + $0x2b4] sm:$0xf0]  ;;  %v3651_v18 = vld [vmem:[#allocation2 + $0x388] sm:$0xf] }
  0x75   :  { %1614 = vmatpush.bf16.msrb.mxu2 %v3300_v23  ;;  %1627 = vmatpush.bf16.msrb.mxu3 %v3428_v27  ;;  %v4768_v23 = vld [vmem:[#allocation2 + $0x134] sm:$0xf0]  ;;  %v3984_v27 = vor.u32 %v4925_v15, %v3981_v17  ;;  %v3507_v30 = vld [vmem:[#allocation2 + $0x268] sm:$0xf] }
  0x76   :  { %1589 = vmatpush.bf16.msrb.mxu0 %v3920_v33  ;;  %v3348_v32 = vor.u32 %v4768_v23, %v3347_v22  ;;  %v4732_v33 = vld [vmem:[#allocation2 + $0x14] sm:$0xf0]  ;;  %v3779_v23 = vld [vmem:[#allocation2 + $0x488] sm:$0xf] }
  0x77   :  { %1602 = vmatpush.bf16.msrb.mxu1 %v4048_v34  ;;  %v3331_v34 = vld [vmem:[#allocation2 + $0x108] sm:$0xf]  ;;  %v3204_v47 = vor.u32 %v4732_v33, %v3203_v31  ;;  %v4848_v8 = vld [vmem:[#allocation2 + $0x3b4] sm:$0xf0] }
  0x78   :  { %v3668_v14 = vor.u32 %v4848_v8, %v3667_v5  ;;  %v4812_v17 = vld [vmem:[#allocation2 + $0x294] sm:$0xf0]  ;;  %v3891_v38 = vld [vmem:[#allocation2 + $0x568] sm:$0xf] }
  0x79   :  { %1615 = vmatpush.bf16.msrb.mxu2 %v3284_v35  ;;  %1628 = vmatpush.bf16.msrb.mxu3 %v3412_v42  ;;  %v4764_v35 = vld [vmem:[#allocation2 + $0x114] sm:$0xf0]  ;;  %v3840_v42 = vor.u32 %v4889_v25, %v3837_v26  ;;  %v3907_v25 = vld [vmem:[#allocation2 + $0x588] sm:$0xf] }
  0x7a   :  { %1590 = vmatpush.bf16.msrb.mxu0 %v3904_v48  ;;  %v3955_v48 = vld [vmem:[#allocation2 + $0x5e8] sm:$0xf]  ;;  %v4844_v22 = vld [vmem:[#allocation2 + $0x394] sm:$0xf0] }
  0x7b   :  { %1603 = vmatpush.bf16.msrb.mxu1 %v4032_v49  ;;  %v4920_v49 = vld [vmem:[#allocation2 + $0x5f4] sm:$0xf0]  ;;  %v3491_v45 = vld [vmem:[#allocation2 + $0x248] sm:$0xf] }
  0x7c   :  { %v3956_v57 = vor.u32 %v4920_v49, %v3955_v48  ;;  %v4908_v26 = vld [vmem:[#allocation2 + $0x594] sm:$0xf0] }
  0x7d   :  { %1616 = vmatpush.bf16.msrb.mxu2 %v3268_v50  ;;  %1629 = vmatpush.bf16.msrb.mxu3 %v3396_v54  ;;  %v3332_v50 = vor.u32 %v4764_v35, %v3331_v34  ;;  %v3555_v54 = vld [vmem:[#allocation2 + $0x2c8] sm:$0xf]  ;;  %v4808_v31 = vld [vmem:[#allocation2 + $0x274] sm:$0xf0]  ;;  %v3908_v33 = vor.u32 %v4908_v26, %v3907_v25 }
  0x7e   :  { %1591 = vmatpush.bf16.msrb.mxu0 %v3888_v60  ;;  %v4884_v60 = vld [vmem:[#allocation2 + $0x4d4] sm:$0xf0]  ;;  %v3556_v63 = vor.u32 %v4820_v55, %v3555_v54  ;;  %v3763_v35 = vld [vmem:[#allocation2 + $0x468] sm:$0xf] }
  0x7f   :  { %1604 = vmatpush.bf16.msrb.mxu1 %v4016_v61  ;;  %v3939_v61 = vld [vmem:[#allocation2 + $0x5c8] sm:$0xf]  ;;  %v3812_v1 = vor.u32 %v4884_v60, %v3811_v59  ;;  %v4840_v34 = vld [vmem:[#allocation2 + $0x374] sm:$0xf0] }
  0x80   :  { %v4872_v36 = vld [vmem:[#allocation2 + $0x474] sm:$0xf0]  ;;  %v3603_v59 = vld [vmem:[#allocation2 + $0x328] sm:$0xf] }
  0x81   :  { %1617 = vmatpush.bf16.msrb.mxu2 %v3252_v62  ;;  %1630 = vmatpush.bf16.msrb.mxu3 %v3380_v2  ;;  %v4916_v62 = vld [vmem:[#allocation2 + $0x5d4] sm:$0xf0]  ;;  %v3539_v2 = vld [vmem:[#allocation2 + $0x2a8] sm:$0xf]  ;;  %v3764_v44 = vor.u32 %v4872_v36, %v3763_v35  ;;  %v4754_v35 = vld [vmem:[#allocation2 + $0xcc] sm:$0xf] }
  0x82   :  { %1592 = vmatpush.bf16.msrb.mxu0 %v3872_v10  ;;  %v3940_v7 = vor.u32 %v4916_v62, %v3939_v61  ;;  %v4880_v10 = vld [vmem:[#allocation2 + $0x4b4] sm:$0xf0]  ;;  %v3540_v13 = vor.u32 %v4816_v3, %v3539_v2  ;;  %v3731_v62 = vld [vmem:[#allocation2 + $0x428] sm:$0xf] }
  0x83   :  { %1605 = vmatpush.bf16.msrb.mxu1 %v4000_v11  ;;  %v3923_v11 = vld [vmem:[#allocation2 + $0x5a8] sm:$0xf]  ;;  %v3796_v15 = vor.u32 %v4880_v10, %v3795_v9  ;;  %v4904_v39 = vld [vmem:[#allocation2 + $0x574] sm:$0xf0] }
  0x84   :  { %v3892_v48 = vor.u32 %v4904_v39, %v3891_v38  ;;  %v4836_v49 = vld [vmem:[#allocation2 + $0x354] sm:$0xf0]  ;;  %v3459_v3 = vld [vmem:[#allocation2 + $0x208] sm:$0xf]  ;;  %v3301_v38 = vld [vmem:[#allocation2 + $0xd8] sm:$0xf0] }
  0x85   :  { %1618 = vmatpush.bf16.msrb.mxu2 %v3236_v12  ;;  %1631 = vmatpush.bf16.msrb.mxu3 %v3364_v16  ;;  %v4912_v12 = vld [vmem:[#allocation2 + $0x5b4] sm:$0xf0]  ;;  %v3523_v16 = vld [vmem:[#allocation2 + $0x288] sm:$0xf]  ;;  %v4786_v39 = vld [vmem:[#allocation2 + $0x1cc] sm:$0xf] }
  0x86   :  { %1593 = vmatpush.bf16.msrb.mxu0 %v3856_v24  ;;  %v3924_v19 = vor.u32 %v4912_v12, %v3923_v11  ;;  %v4876_v24 = vld [vmem:[#allocation2 + $0x494] sm:$0xf0]  ;;  %v3587_v9 = vld [vmem:[#allocation2 + $0x308] sm:$0xf] }
  0x87   :  { %1606 = vmatpush.bf16.msrb.mxu1 %v3984_v27  ;;  %v3524_v27 = vor.u32 %v4812_v17, %v3523_v16  ;;  %v3780_v29 = vor.u32 %v4876_v24, %v3779_v23  ;;  %v4800_v58 = vld [vmem:[#allocation2 + $0x234] sm:$0xf0]  ;;  %v3715_v11 = vld [vmem:[#allocation2 + $0x408] sm:$0xf]  ;;  %v4790_v23 = vld [vmem:[#allocation2 + $0x1ec] sm:$0xf] }
  0x88   :  { %v4832_v61 = vld [vmem:[#allocation2 + $0x334] sm:$0xf0]  ;;  %v4083_v16 = vld [vmem:[#allocation2 + $0x6e8] sm:$0xf]  ;;  %v3445_v24 = vld [vmem:[#allocation2 + $0x1f8] sm:$0xf0] }
  0x89   :  { %1619 = vmatpush.bf16.msrb.mxu2 %v3220_v28  ;;  %1632 = vmatpush.bf16.msrb.mxu3 %v3348_v32  ;;  %v3652_v28 = vor.u32 %v4844_v22, %v3651_v18  ;;  %v3635_v32 = vld [vmem:[#allocation2 + $0x368] sm:$0xf]  ;;  %v4796_v5 = vld [vmem:[#allocation2 + $0x214] sm:$0xf0]  ;;  %v4758_v18 = vld [vmem:[#allocation2 + $0xec] sm:$0xf] }
  0x8a   :  { %1594 = vmatpush.bf16.msrb.mxu0 %v3840_v42  ;;  %v3508_v42 = vor.u32 %v4808_v31, %v3507_v30  ;;  %v3636_v43 = vor.u32 %v4840_v34, %v3635_v32  ;;  %v4828_v10 = vld [vmem:[#allocation2 + $0x314] sm:$0xf0]  ;;  %v3317_v22 = vld [vmem:[#allocation2 + $0xf8] sm:$0xf0]  ;;  %v3448_v32 = vor.u32 %v4790_v23, %v3445_v24  ;;  %v4003_v24 = vld [vmem:[#allocation2 + $0x648] sm:$0xf] }
  0x8b   :  { %1607 = vmatpush.bf16.msrb.mxu1 %v3968_v46  ;;  %v4804_v46 = vld [vmem:[#allocation2 + $0x254] sm:$0xf0]  ;;  %v3588_v25 = vor.u32 %v4828_v10, %v3587_v9  ;;  %v3320_v31 = vor.u32 %v4758_v18, %v3317_v22  ;;  %v4019_v10 = vld [vmem:[#allocation2 + $0x668] sm:$0xf]  ;;  %v3509_v18 = vld [vmem:[#allocation2 + $0x278] sm:$0xf0] }
  0x8c   :  { %v3492_v54 = vor.u32 %v4804_v46, %v3491_v45  ;;  %v4952_v17 = vld [vmem:[#allocation2 + $0x6f4] sm:$0xf0]  ;;  %v3304_v46 = vor.u32 %v4754_v35, %v3301_v38 }
  0x8d   :  { %1620 = vmatpush.bf16.msrb.mxu2 %v3204_v47  ;;  %1633 = vmatpush.bf16.msrb.mxu3 %v3332_v50  ;;  %v3619_v47 = vld [vmem:[#allocation2 + $0x348] sm:$0xf]  ;;  %v4084_v30 = vor.u32 %v4952_v17, %v4083_v16  ;;  %v4948_v34 = vld [vmem:[#allocation2 + $0x6d4] sm:$0xf0]  ;;  %v3381_v16 = vld [vmem:[#allocation2 + $0x178] sm:$0xf0] }
  0x8e   :  { %1639 = vmatpush.bf16.msra.mxu0 %v3572_v51  ;;  %1608 = vmatmul.bf16.vlgmr.msrb.gmra.mxu1 %v5243_v37  ;;  %v3747_v50 = vld [vmem:[#allocation2 + $0x448] sm:$0xf]  ;;  %v4868_v51 = vld [vmem:[#allocation2 + $0x454] sm:$0xf0]  ;;  %v3620_v55 = vor.u32 %v4836_v49, %v3619_v47  ;;  %v4806_v17 = vld [vmem:[#allocation2 + $0x26c] sm:$0xf] }
  0x8f   :  { %1652 = vmatpush.bf16.msra.mxu1 %v3700_v52  ;;  %1595 = vmatmul.bf16.vlgmr.msrb.gmra.mxu0 %v5247_v41  ;;  %v3875_v52 = vld [vmem:[#allocation2 + $0x548] sm:$0xf]  ;;  %v3748_v56 = vor.u32 %v4868_v51, %v3747_v50  ;;  %v4944_v49 = vld [vmem:[#allocation2 + $0x6b4] sm:$0xf0]  ;;  %v4750_v50 = vld [vmem:[#allocation2 + $0xac] sm:$0xf] }
  0x90   :  { %1621 = vmatmul.bf16.vlgmr.msrb.gmra.mxu2 %v5230_v20  ;;  %1634 = vmatmul.bf16.vlgmr.msrb.gmra.mxu3 %v5232_v21 }
  0x91   :  { %1665 = vmatpush.bf16.msra.mxu2 %v3828_v53  ;;  %1678 = vmatpush.bf16.msra.mxu3 %v3956_v57  ;;  %v4900_v53 = vld [vmem:[#allocation2 + $0x554] sm:$0xf0]  ;;  %v3475_v57 = vld [vmem:[#allocation2 + $0x228] sm:$0xf] }
  0x92   :  { %1640 = vmatpush.bf16.msra.mxu0 %v3556_v63  ;;  %v3876_v60 = vor.u32 %v4900_v53, %v3875_v52  ;;  %v4864_v63 = vld [vmem:[#allocation2 + $0x434] sm:$0xf0]  ;;  %v3476_v2 = vor.u32 %v4800_v58, %v3475_v57  ;;  %v3285_v52 = vld [vmem:[#allocation2 + $0xb8] sm:$0xf0]  ;;  %v4782_v53 = vld [vmem:[#allocation2 + $0x1ac] sm:$0xf] }
  0x93   :  { %1653 = vmatpush.bf16.msra.mxu1 %v3684_v0  ;;  %v3859_v0 = vld [vmem:[#allocation2 + $0x528] sm:$0xf]  ;;  %v3732_v8 = vor.u32 %v4864_v63, %v3731_v62  ;;  %v3288_v58 = vor.u32 %v4750_v50, %v3285_v52  ;;  %v4746_v62 = vld [vmem:[#allocation2 + $0x8c] sm:$0xf]  ;;  %v3477_v52 = vld [vmem:[#allocation2 + $0x238] sm:$0xf0] }
  0x95   :  { %1666 = vmatpush.bf16.msra.mxu2 %v3812_v1  ;;  %1679 = vmatpush.bf16.msra.mxu3 %v3940_v7  ;;  %v4896_v1 = vld [vmem:[#allocation2 + $0x534] sm:$0xf0]  ;;  %v3604_v7 = vor.u32 %v4832_v61, %v3603_v59 }
  0x96   :  { %1641 = vmatpush.bf16.msra.mxu0 %v3540_v13  ;;  %v3860_v12 = vor.u32 %v4896_v1, %v3859_v0  ;;  %v4860_v13 = vld [vmem:[#allocation2 + $0x414] sm:$0xf0]  ;;  %v3269_v0 = vld [vmem:[#allocation2 + $0x98] sm:$0xf0]  ;;  %v4778_v1 = vld [vmem:[#allocation2 + $0x18c] sm:$0xf] }
  0x97   :  { %1654 = vmatpush.bf16.msra.mxu1 %v3668_v14  ;;  %v3843_v14 = vld [vmem:[#allocation2 + $0x508] sm:$0xf]  ;;  %v3716_v26 = vor.u32 %v4860_v13, %v3715_v11  ;;  %v4940_v61 = vld [vmem:[#allocation2 + $0x694] sm:$0xf0] }
  0x98   :  { %v4936_v11 = vld [vmem:[#allocation2 + $0x674] sm:$0xf0] }
  0x99   :  { %1667 = vmatpush.bf16.msra.mxu2 %v3796_v15  ;;  %1680 = vmatpush.bf16.msra.mxu3 %v3924_v19  ;;  %v4892_v15 = vld [vmem:[#allocation2 + $0x514] sm:$0xf0]  ;;  %v3460_v19 = vor.u32 %v4796_v5, %v3459_v3  ;;  %v4810_v3 = vld [vmem:[#allocation2 + $0x28c] sm:$0xf]  ;;  %v3525_v5 = vld [vmem:[#allocation2 + $0x298] sm:$0xf0] }
  0x9a   :  { %1642 = vmatpush.bf16.msra.mxu0 %v3524_v27  ;;  %v4822_v27 = vld [vmem:[#allocation2 + $0x2ec] sm:$0xf]  ;;  %v3528_v13 = vor.u32 %v4810_v3, %v3525_v5  ;;  %v3701_v5 = vld [vmem:[#allocation2 + $0x3f8] sm:$0xf0] }
  0x9b   :  { %1655 = vmatpush.bf16.msra.mxu1 %v3652_v28  ;;  %v3573_v28 = vld [vmem:[#allocation2 + $0x2f8] sm:$0xf0]  ;;  %v4854_v3 = vld [vmem:[#allocation2 + $0x3ec] sm:$0xf] }
  0x9c   :  { %v3576_v36 = vor.u32 %v4822_v27, %v3573_v28  ;;  %v3512_v27 = vor.u32 %v4806_v17, %v3509_v18  ;;  %v3237_v28 = vld [vmem:[#allocation2 + $0x58] sm:$0xf0] }
  0x9d   :  { %1668 = vmatpush.bf16.msra.mxu2 %v3780_v29  ;;  %1681 = vmatpush.bf16.msra.mxu3 %v3908_v33  ;;  %v3844_v29 = vor.u32 %v4892_v15, %v3843_v14  ;;  %v4067_v33 = vld [vmem:[#allocation2 + $0x6c8] sm:$0xf]  ;;  %v3253_v14 = vld [vmem:[#allocation2 + $0x78] sm:$0xf0]  ;;  %v4774_v15 = vld [vmem:[#allocation2 + $0x16c] sm:$0xf] }
  0x9e   :  { %1643 = vmatpush.bf16.msra.mxu0 %v3508_v42  ;;  %v3429_v42 = vld [vmem:[#allocation2 + $0x1d8] sm:$0xf0]  ;;  %v4068_v45 = vor.u32 %v4948_v34, %v4067_v33  ;;  %v3384_v23 = vor.u32 %v4774_v15, %v3381_v16  ;;  %v4950_v16 = vld [vmem:[#allocation2 + $0x6ec] sm:$0xf] }
  0x9f   :  { %1656 = vmatpush.bf16.msra.mxu1 %v3636_v43  ;;  %v4818_v43 = vld [vmem:[#allocation2 + $0x2cc] sm:$0xf]  ;;  %v3432_v47 = vor.u32 %v4786_v39, %v3429_v42  ;;  %v3987_v39 = vld [vmem:[#allocation2 + $0x628] sm:$0xf]  ;;  %v4928_v42 = vld [vmem:[#allocation2 + $0x634] sm:$0xf0] }
  0xa0   :  { %v4085_v17 = vld [vmem:[#allocation2 + $0x6f8] sm:$0xf0] }
  0xa1   :  { %1669 = vmatpush.bf16.msra.mxu2 %v3764_v44  ;;  %1682 = vmatpush.bf16.msra.mxu3 %v3892_v48  ;;  %v3557_v44 = vld [vmem:[#allocation2 + $0x2d8] sm:$0xf0]  ;;  %v4051_v48 = vld [vmem:[#allocation2 + $0x6a8] sm:$0xf] }
  0xa2   :  { %1644 = vmatpush.bf16.msra.mxu0 %v3492_v54  ;;  %v3560_v51 = vor.u32 %v4818_v43, %v3557_v44  ;;  %v3413_v54 = vld [vmem:[#allocation2 + $0x1b8] sm:$0xf0]  ;;  %v4052_v57 = vor.u32 %v4944_v49, %v4051_v48  ;;  %v4734_v43 = vld [vmem:[#allocation2 + $0x2c] sm:$0xf] }
  0xa3   :  { %1657 = vmatpush.bf16.msra.mxu1 %v3620_v55  ;;  %v4814_v55 = vld [vmem:[#allocation2 + $0x2ac] sm:$0xf]  ;;  %v3416_v59 = vor.u32 %v4782_v53, %v3413_v54  ;;  %v3349_v49 = vld [vmem:[#allocation2 + $0x138] sm:$0xf0]  ;;  %v3988_v54 = vor.u32 %v4928_v42, %v3987_v39 }
  0xa4   :  { %v4766_v48 = vld [vmem:[#allocation2 + $0x12c] sm:$0xf]  ;;  %v3669_v42 = vld [vmem:[#allocation2 + $0x3b8] sm:$0xf0] }
  0xa5   :  { %1670 = vmatpush.bf16.msra.mxu2 %v3748_v56  ;;  %1683 = vmatpush.bf16.msra.mxu3 %v3876_v60  ;;  %v3541_v56 = vld [vmem:[#allocation2 + $0x2b8] sm:$0xf0]  ;;  %v4035_v60 = vld [vmem:[#allocation2 + $0x688] sm:$0xf]  ;;  %v4846_v39 = vld [vmem:[#allocation2 + $0x3ac] sm:$0xf] }
  0xa6   :  { %1645 = vmatpush.bf16.msra.mxu0 %v3476_v2  ;;  %v3544_v63 = vor.u32 %v4814_v55, %v3541_v56  ;;  %v3397_v2 = vld [vmem:[#allocation2 + $0x198] sm:$0xf0]  ;;  %v3971_v55 = vld [vmem:[#allocation2 + $0x608] sm:$0xf]  ;;  %v4924_v56 = vld [vmem:[#allocation2 + $0x614] sm:$0xf0] }
  0xa7   :  { %1658 = vmatpush.bf16.msra.mxu1 %v3604_v7  ;;  %v4036_v7 = vor.u32 %v4940_v61, %v4035_v60  ;;  %v3400_v9 = vor.u32 %v4778_v1, %v3397_v2  ;;  %v3205_v60 = vld [vmem:[#allocation2 + $0x18] sm:$0xf0]  ;;  %v4762_v61 = vld [vmem:[#allocation2 + $0x10c] sm:$0xf] }
  0xa8   :  { %v4794_v1 = vld [vmem:[#allocation2 + $0x20c] sm:$0xf]  ;;  %v3461_v2 = vld [vmem:[#allocation2 + $0x218] sm:$0xf0] }
  0xa9   :  { %1671 = vmatpush.bf16.msra.mxu2 %v3732_v8  ;;  %1684 = vmatpush.bf16.msra.mxu3 %v3860_v12  ;;  %v3272_v8 = vor.u32 %v4746_v62, %v3269_v0  ;;  %v4742_v12 = vld [vmem:[#allocation2 + $0x6c] sm:$0xf]  ;;  %v3333_v0 = vld [vmem:[#allocation2 + $0x118] sm:$0xf0] }
  0xaa   :  { %1646 = vmatpush.bf16.msra.mxu0 %v3460_v19  ;;  %v4020_v19 = vor.u32 %v4936_v11, %v4019_v10  ;;  %v3256_v22 = vor.u32 %v4742_v12, %v3253_v14  ;;  %v1440_v33 = vpop.f32.mrf.mxu0  ;;  %v3829_v10 = vld [vmem:[#allocation2 + $0x4f8] sm:$0xf0]  ;;  %v4918_v11 = vld [vmem:[#allocation2 + $0x5ec] sm:$0xf]  ;;  %v3336_v15 = vor.u32 %v4762_v61, %v3333_v0 }
  0xab   :  { %1659 = vmatpush.bf16.msra.mxu1 %v3588_v25  ;;  %v4932_v25 = vld [vmem:[#allocation2 + $0x654] sm:$0xf0]  ;;  %v1453_v35 = vpop.f32.mrf.mxu1  ;;  %v3957_v12 = vld [vmem:[#allocation2 + $0x5f8] sm:$0xf0] }
  0xac   :  { %v4004_v34 = vor.u32 %v4932_v25, %v4003_v24  ;;  %v1454_v44 = vadd.f32 %v1453_v35, %v1440_v33  ;;  %v3960_v25 = vor.u32 %v4918_v11, %v3957_v12  ;;  %v4946_v33 = vld [vmem:[#allocation2 + $0x6cc] sm:$0xf]  ;;  %v4021_v11 = vld [vmem:[#allocation2 + $0x678] sm:$0xf0] }
  0xad   :  { %1672 = vmatpush.bf16.msra.mxu2 %v3716_v26  ;;  %1685 = vmatpush.bf16.msra.mxu3 %v3844_v29  ;;  %v4738_v26 = vld [vmem:[#allocation2 + $0x4c] sm:$0xf] }
  0xae   :  { %1691 = vmatpush.bf16.msrb.mxu0 %v4084_v30  ;;  %1660 = vmatmul.bf16.vlgmr.msra.gmra.mxu1 %v5227_v6  ;;  %v4770_v29 = vld [vmem:[#allocation2 + $0x14c] sm:$0xf]  ;;  %v3365_v30 = vld [vmem:[#allocation2 + $0x158] sm:$0xf0] }
  0xaf   :  { %1704 = vmatpush.bf16.msrb.mxu1 %v3320_v31  ;;  %1647 = vmatmul.bf16.vlgmr.msra.gmra.mxu0 %v5222_v4  ;;  %v4802_v31 = vld [vmem:[#allocation2 + $0x24c] sm:$0xf]  ;;  %v3368_v38 = vor.u32 %v4770_v29, %v3365_v30  ;;  %v4088_v29 = vor.u32 %v4950_v16, %v4085_v17  ;;  %v3813_v30 = vld [vmem:[#allocation2 + $0x4d8] sm:$0xf0] }
  0xb0   :  { %1673 = vmatmul.bf16.vlgmr.msra.gmra.mxu2 %v5245_v40  ;;  %1686 = vmatmul.bf16.vlgmr.msra.gmra.mxu3 %v5247_v41  ;;  %v3621_v16 = vld [vmem:[#allocation2 + $0x358] sm:$0xf0]  ;;  %v4866_v17 = vld [vmem:[#allocation2 + $0x44c] sm:$0xf] }
  0xb1   :  { %1717 = vmatpush.bf16.msrb.mxu2 %v3448_v32  ;;  %1730 = vmatpush.bf16.msrb.mxu3 %v3576_v36  ;;  %v3493_v32 = vld [vmem:[#allocation2 + $0x258] sm:$0xf0]  ;;  %v3240_v36 = vor.u32 %v4738_v26, %v3237_v28  ;;  %v4850_v26 = vld [vmem:[#allocation2 + $0x3cc] sm:$0xf] }
  0xb2   :  { %1692 = vmatpush.bf16.msrb.mxu0 %v4068_v45  ;;  %v4882_v28 = vld [vmem:[#allocation2 + $0x4cc] sm:$0xf] }
  0xb3   :  { %1705 = vmatpush.bf16.msrb.mxu1 %v3304_v46  ;;  %v3496_v46 = vor.u32 %v4802_v31, %v3493_v32  ;;  %v4914_v31 = vld [vmem:[#allocation2 + $0x5cc] sm:$0xf]  ;;  %v3941_v32 = vld [vmem:[#allocation2 + $0x5d8] sm:$0xf0] }
  0xb5   :  { %1718 = vmatpush.bf16.msrb.mxu2 %v3432_v47  ;;  %1731 = vmatpush.bf16.msrb.mxu3 %v3560_v51  ;;  %v3221_v47 = vld [vmem:[#allocation2 + $0x38] sm:$0xf0]  ;;  %v4798_v51 = vld [vmem:[#allocation2 + $0x22c] sm:$0xf] }
  0xb6   :  { %1693 = vmatpush.bf16.msrb.mxu0 %v4052_v57  ;;  %v3224_v57 = vor.u32 %v4734_v43, %v3221_v47  ;;  %v4878_v43 = vld [vmem:[#allocation2 + $0x4ac] sm:$0xf]  ;;  %v3925_v47 = vld [vmem:[#allocation2 + $0x5b8] sm:$0xf0] }
  0xb7   :  { %1706 = vmatpush.bf16.msrb.mxu1 %v3288_v58  ;;  %v3352_v58 = vor.u32 %v4766_v48, %v3349_v49  ;;  %v4942_v48 = vld [vmem:[#allocation2 + $0x6ac] sm:$0xf]  ;;  %v4053_v49 = vld [vmem:[#allocation2 + $0x6b8] sm:$0xf0] }
  0xb9   :  { %1719 = vmatpush.bf16.msrb.mxu2 %v3416_v59  ;;  %1732 = vmatpush.bf16.msrb.mxu3 %v3544_v63  ;;  %v4730_v59 = vld [vmem:[#allocation2 + $0xc] sm:$0xf]  ;;  %v3480_v63 = vor.u32 %v4798_v51, %v3477_v52 }
  0xba   :  { %1694 = vmatpush.bf16.msrb.mxu0 %v4036_v7  ;;  %v4886_v7 = vld [vmem:[#allocation2 + $0x4ec] sm:$0xf]  ;;  %v3208_v14 = vor.u32 %v4730_v59, %v3205_v60  ;;  %v4037_v60 = vld [vmem:[#allocation2 + $0x698] sm:$0xf0] }
  0xbb   :  { %1707 = vmatpush.bf16.msrb.mxu1 %v3272_v8  ;;  %v1466_v45 = vpop.f32.mrf.mxu2  ;;  %v1479_v50 = vpop.f32.mrf.mxu3  ;;  %v3832_v24 = vor.u32 %v4886_v7, %v3829_v10  ;;  %v4938_v59 = vld [vmem:[#allocation2 + $0x68c] sm:$0xf]  ;;  %v3765_v7 = vld [vmem:[#allocation2 + $0x478] sm:$0xf0] }
  0xbc   :  { %v1467_v53 = vadd.f32 %v1466_v45, %v1454_v44  ;;  %v1442_v8 = vpop.f32.mrf.mxu0  ;;  %v3797_v45 = vld [vmem:[#allocation2 + $0x4b8] sm:$0xf0]  ;;  %v4934_v10 = vld [vmem:[#allocation2 + $0x66c] sm:$0xf] }
  0xbd   :  { %1720 = vmatpush.bf16.msrb.mxu2 %v3400_v9  ;;  %1733 = vmatpush.bf16.msrb.mxu3 %v3528_v13  ;;  %v3972_v9 = vor.u32 %v4924_v56, %v3971_v55  ;;  %v1455_v13 = vpop.f32.mrf.mxu1  ;;  %v3800_v51 = vor.u32 %v4878_v43, %v3797_v45  ;;  %v4874_v55 = vld [vmem:[#allocation2 + $0x48c] sm:$0xf]  ;;  %v4056_v56 = vor.u32 %v4942_v48, %v4053_v49  ;;  %v3589_v49 = vld [vmem:[#allocation2 + $0x318] sm:$0xf0] }
  0xbe   :  { %1695 = vmatpush.bf16.msrb.mxu0 %v4020_v19  ;;  %v5265_v62 = vadd.f32 %v1479_v50, %v1467_v53  ;;  %v3464_v19 = vor.u32 %v4794_v1, %v3461_v2  ;;  %v3672_v50 = vor.u32 %v4846_v39, %v3669_v42  ;;  %v4842_v53 = vld [vmem:[#allocation2 + $0x38c] sm:$0xf]  ;;  %v3637_v2 = vld [vmem:[#allocation2 + $0x378] sm:$0xf0] }
  0xbf   :  { %1708 = vmatpush.bf16.msrb.mxu1 %v3256_v22  ;;  %v3704_v22 = vor.u32 %v4854_v3, %v3701_v5  ;;  %v4838_v1 = vld [vmem:[#allocation2 + $0x36c] sm:$0xf]  ;;  %v4040_v5 = vor.u32 %v4938_v59, %v4037_v60  ;;  %v3861_v42 = vld [vmem:[#allocation2 + $0x538] sm:$0xf0] }
  0xc0   :  { %v4870_v3 = vld [vmem:[#allocation2 + $0x46c] sm:$0xf]  ;;  %v3640_v12 = vor.u32 %v4838_v1, %v3637_v2 }
  0xc1   :  { %1721 = vmatpush.bf16.msrb.mxu2 %v3384_v23  ;;  %1734 = vmatpush.bf16.msrb.mxu3 %v3512_v27  ;;  %v3685_v27 = vld [vmem:[#allocation2 + $0x3d8] sm:$0xf0]  ;;  %v4902_v8 = vld [vmem:[#allocation2 + $0x56c] sm:$0xf]  ;;  %v3768_v13 = vor.u32 %v4870_v3, %v3765_v7  ;;  %v4187_v7 = vld [vmem:[#allocation4 + $0xc0] sm:$0xf] }
  0xc2   :  { %1696 = vmatpush.bf16.msrb.mxu0 %v4004_v34  ;;  %v4069_v34 = vld [vmem:[#allocation2 + $0x6d8] sm:$0xf0]  ;;  %v3688_v35 = vor.u32 %v4850_v26, %v3685_v27  ;;  %v4894_v39 = vld [vmem:[#allocation2 + $0x52c] sm:$0xf] }
  0xc3   :  { %1709 = vmatpush.bf16.msrb.mxu1 %v3240_v36  ;;  %v1468_v18 = vpop.f32.mrf.mxu2  ;;  %v1481_v23 = vpop.f32.mrf.mxu3  ;;  %v3816_v36 = vor.u32 %v4882_v28, %v3813_v30  ;;  %v4072_v44 = vor.u32 %v4946_v33, %v4069_v34  ;;  %v4005_v26 = vld [vmem:[#allocation2 + $0x658] sm:$0xf0]  ;;  %v4830_v33 = vld [vmem:[#allocation2 + $0x32c] sm:$0xf]  ;;  %v3864_v48 = vor.u32 %v4894_v39, %v3861_v42  ;;  %v4995_v39 = vld [vmem:[#allocation4 + $0x14c] sm:$0xf0] }
  0xc4   :  { %v4898_v23 = vld [vmem:[#allocation2 + $0x54c] sm:$0xf]  ;;  %v3605_v34 = vld [vmem:[#allocation2 + $0x338] sm:$0xf0] }
  0xc5   :  { %1722 = vmatpush.bf16.msrb.mxu2 %v3368_v38  ;;  %1735 = vmatpush.bf16.msrb.mxu3 %v3496_v46  ;;  %v3944_v38 = vor.u32 %v4914_v31, %v3941_v32  ;;  %v4910_v46 = vld [vmem:[#allocation2 + $0x5ac] sm:$0xf]  ;;  %v3608_v45 = vor.u32 %v4830_v33, %v3605_v34  ;;  %v4123_v34 = vld [vmem:[#allocation4 + $0x40] sm:$0xf] }
  0xc6   :  { %1697 = vmatpush.bf16.msrb.mxu0 %v3988_v54  ;;  %v3928_v52 = vor.u32 %v4910_v46, %v3925_v47  ;;  %v3653_v54 = vld [vmem:[#allocation2 + $0x398] sm:$0xf0]  ;;  %v4926_v43 = vld [vmem:[#allocation2 + $0x62c] sm:$0xf] }
  0xc7   :  { %1710 = vmatpush.bf16.msrb.mxu1 %v3224_v57  ;;  %v3781_v57 = vld [vmem:[#allocation2 + $0x498] sm:$0xf0]  ;;  %v4826_v46 = vld [vmem:[#allocation2 + $0x30c] sm:$0xf] }
  0xc8   :  { %v3592_v60 = vor.u32 %v4826_v46, %v3589_v49  ;;  %v4107_v46 = vld [vmem:[#allocation4 + $0x20] sm:$0xf] }
  0xc9   :  { %1723 = vmatpush.bf16.msrb.mxu2 %v3352_v58  ;;  %1736 = vmatpush.bf16.msrb.mxu3 %v3480_v63  ;;  %v4906_v58 = vld [vmem:[#allocation2 + $0x58c] sm:$0xf]  ;;  %v4235_v49 = vld [vmem:[#allocation4 + $0x120] sm:$0xf] }
  0xca   :  { %1698 = vmatpush.bf16.msrb.mxu0 %v3972_v9  ;;  %v3893_v9 = vld [vmem:[#allocation2 + $0x578] sm:$0xf0] }
  0xcb   :  { %1711 = vmatpush.bf16.msrb.mxu1 %v3208_v14  ;;  %v5273_v63 = vpop.f32.mrf.mxu1  ;;  %v3896_v14 = vor.u32 %v4902_v8, %v3893_v9  ;;  %v4979_v8 = vld [vmem:[#allocation4 + $0xcc] sm:$0xf0]  ;;  %v4315_v9 = vld [vmem:[#allocation4 + $0x1c0] sm:$0xf] }
  0xcc   :  { %v5271_v61 = vpop.f32.mrf.mxu0 }
  0xcd   :  { %1724 = vmatpush.bf16.msrb.mxu2 %v3336_v15  ;;  %1737 = vmatpush.bf16.msrb.mxu3 %v3464_v19  ;;  %v4834_v15 = vld [vmem:[#allocation2 + $0x34c] sm:$0xf]  ;;  %v4024_v19 = vor.u32 %v4934_v10, %v4021_v11  ;;  %v5011_v10 = vld [vmem:[#allocation4 + $0x1cc] sm:$0xf0]  ;;  %v4188_v11 = vor.u32 %v4979_v8, %v4187_v7  ;;  %v4189_v7 = vld [vmem:[#allocation4 + $0xd0] sm:$0xf0] }
  0xce   :  { %1743 = vmatpush.bf16.msra.mxu0 %v3704_v22  ;;  %1712 = vmatmul.bf16.vlgmr.msrb.gmra.mxu1 %v5230_v20  ;;  %v3784_v20 = vor.u32 %v4874_v55, %v3781_v57  ;;  %v3749_v22 = vld [vmem:[#allocation2 + $0x458] sm:$0xf0]  ;;  %v3624_v28 = vor.u32 %v4834_v15, %v3621_v16  ;;  %v4299_v15 = vld [vmem:[#allocation4 + $0x1a0] sm:$0xf]  ;;  %v5007_v16 = vld [vmem:[#allocation4 + $0x1ac] sm:$0xf0] }
  0xcf   :  { %1756 = vmatpush.bf16.msra.mxu1 %v3832_v24  ;;  %1699 = vmatmul.bf16.vlgmr.msrb.gmra.mxu0 %v5243_v37  ;;  %v3877_v24 = vld [vmem:[#allocation2 + $0x558] sm:$0xf0]  ;;  %v3752_v31 = vor.u32 %v4866_v17, %v3749_v22  ;;  %v1797_v17 = vld [vmem:[%s5455_s2] sm:$0xf]  ;;  %v4155_v22 = vld [vmem:[#allocation4 + $0x80] sm:$0xf] }
  0xd0   :  { %1725 = vmatmul.bf16.vlgmr.msrb.gmra.mxu2 %v5232_v21  ;;  %1738 = vmatmul.bf16.vlgmr.msrb.gmra.mxu3 %v5222_v4  ;;  %v3909_v21 = vld [vmem:[#allocation2 + $0x598] sm:$0xf0]  ;;  %v3656_v4 = vor.u32 %v4842_v53, %v3653_v54  ;;  %v3880_v32 = vor.u32 %v4898_v23, %v3877_v24  ;;  %v4890_v54 = vld [vmem:[#allocation2 + $0x50c] sm:$0xf]  ;;  %1799 = vst [vmem:[#allocation1] ss:$9 sm:$0xff] %v1797_v17 }
  0xd1   :  { %1769 = vmatpush.bf16.msra.mxu2 %v3960_v25  ;;  %1782 = vmatpush.bf16.msra.mxu3 %v4088_v29  ;;  %v3912_v0 = vor.u32 %v4906_v58, %v3909_v21  ;;  %v4930_v25 = vld [vmem:[#allocation2 + $0x64c] sm:$0xf]  ;;  %v3845_v55 = vld [vmem:[#allocation2 + $0x518] sm:$0xf0]  ;;  %v4203_v58 = vld [vmem:[#allocation4 + $0xe0] sm:$0xf] }
  0xd2   :  { %1744 = vmatpush.bf16.msra.mxu0 %v3688_v35  ;;  %v4862_v35 = vld [vmem:[#allocation2 + $0x42c] sm:$0xf]  ;;  %v3973_v57 = vld [vmem:[#allocation2 + $0x618] sm:$0xf0]  ;;  %v4983_v21 = vld [vmem:[#allocation4 + $0xec] sm:$0xf0]  ;;  %v3848_v1 = vor.u32 %v4890_v54, %v3845_v55 }
  0xd3   :  { %1757 = vmatpush.bf16.msra.mxu1 %v3816_v36  ;;  %v5275_v18 = vpop.f32.mrf.mxu2  ;;  %v5277_v27 = vpop.f32.mrf.mxu3  ;;  %v4008_v36 = vor.u32 %v4930_v25, %v4005_v26  ;;  %v4204_v3 = vor.u32 %v4983_v21, %v4203_v58  ;;  %v4971_v23 = vld [vmem:[#allocation4 + $0x8c] sm:$0xf0]  ;;  %v4283_v24 = vld [vmem:[#allocation4 + $0x180] sm:$0xf]  ;;  %v4981_v58 = vld [vmem:[#allocation4 + $0xe4] sm:$0xf] }
  0xd4   :  { %v1494_v29 = vpop.f32.mrf.mxu0  ;;  %v1507_v30 = vpop.f32.mrf.mxu1  ;;  %v5003_v25 = vld [vmem:[#allocation4 + $0x18c] sm:$0xf0]  ;;  %v4219_v55 = vld [vmem:[#allocation4 + $0x100] sm:$0xf]  ;;  %v4205_v21 = vld [vmem:[#allocation4 + $0xf0] sm:$0xf0] }
  0xd5   :  { %1770 = vmatpush.bf16.msra.mxu2 %v3944_v38  ;;  %1783 = vmatpush.bf16.msra.mxu3 %v4072_v44  ;;  %v3733_v38 = vld [vmem:[#allocation2 + $0x438] sm:$0xf0]  ;;  %v4284_v26 = vor.u32 %v5003_v25, %v4283_v24  ;;  %v4267_v30 = vld [vmem:[#allocation4 + $0x160] sm:$0xf]  ;;  %v4955_v54 = vld [vmem:[#allocation4 + $0xc] sm:$0xf0] }
  0xd6   :  { %1745 = vmatpush.bf16.msra.mxu0 %v3672_v50  ;;  %v3989_v44 = vld [vmem:[#allocation2 + $0x638] sm:$0xf0]  ;;  %v3736_v47 = vor.u32 %v4862_v35, %v3733_v38  ;;  %v4858_v50 = vld [vmem:[#allocation2 + $0x40c] sm:$0xf]  ;;  %v4963_v35 = vld [vmem:[#allocation4 + $0x4c] sm:$0xf0] }
  0xd7   :  { %1758 = vmatpush.bf16.msra.mxu1 %v3800_v51  ;;  %v3717_v51 = vld [vmem:[#allocation2 + $0x418] sm:$0xf0]  ;;  %v3992_v53 = vor.u32 %v4926_v43, %v3989_v44  ;;  %v4251_v38 = vld [vmem:[#allocation4 + $0x140] sm:$0xf]  ;;  %v4124_v43 = vor.u32 %v4963_v35, %v4123_v34  ;;  %v5009_v8 = vld [vmem:[#allocation4 + $0x1c4] sm:$0xf] }
  0xd8   :  { %v1801_v17 = vld [vmem:[#allocation1 + $0x9] sm:$0xff]  ;;  %v4157_v25 = vld [vmem:[#allocation4 + $0x90] sm:$0xf0] }
  0xd9   :  { %1771 = vmatpush.bf16.msra.mxu2 %v3928_v52  ;;  %1784 = vmatpush.bf16.msra.mxu3 %v4056_v56  ;;  %v4922_v56 = vld [vmem:[#allocation2 + $0x60c] sm:$0xf]  ;;  %v4969_v24 = vld [vmem:[#allocation4 + $0x84] sm:$0xf] }
  0xda   :  { %1746 = vmatpush.bf16.msra.mxu0 %v3656_v4  ;;  %v4331_v4 = vld [vmem:[#allocation4 + $0x1e0] sm:$0xf]  ;;  %v3976_v2 = vor.u32 %v4922_v56, %v3973_v57  ;;  %v4987_v57 = vld [vmem:[#allocation4 + $0x10c] sm:$0xf0]  ;;  %v4965_v35 = vld [vmem:[#allocation4 + $0x64] sm:$0xf] }
  0xdb   :  { %1759 = vmatpush.bf16.msra.mxu1 %v3784_v20  ;;  %v1520_v52 = vpop.f32.mrf.mxu2  ;;  %v1533_v59 = vpop.f32.mrf.mxu3  ;;  %v5015_v20 = vld [vmem:[#allocation4 + $0x1ec] sm:$0xf0] }
  0xdd   :  { %1772 = vmatpush.bf16.msra.mxu2 %v3912_v0  ;;  %1785 = vmatpush.bf16.msra.mxu3 %v4040_v5  ;;  %v3720_v0 = vor.u32 %v4858_v50, %v3717_v51  ;;  %v4332_v5 = vor.u32 %v5015_v20, %v4331_v4  ;;  %v4991_v50 = vld [vmem:[#allocation4 + $0x12c] sm:$0xf0]  ;;  %v4333_v4 = vld [vmem:[#allocation4 + $0x1f0] sm:$0xf0] }
  0xde   :  { %1747 = vmatpush.bf16.msra.mxu0 %v3640_v12  ;;  %v4316_v12 = vor.u32 %v5011_v10, %v4315_v9  ;;  %v4236_v52 = vor.u32 %v4991_v50, %v4235_v49  ;;  %v4317_v9 = vld [vmem:[#allocation4 + $0x1d0] sm:$0xf0]  ;;  %v4993_v50 = vld [vmem:[#allocation4 + $0x144] sm:$0xf] }
  0xdf   :  { %1760 = vmatpush.bf16.msra.mxu1 %v3768_v13  ;;  %v4171_v13 = vld [vmem:[#allocation4 + $0xa0] sm:$0xf]  ;;  %v4125_v49 = vld [vmem:[#allocation4 + $0x50] sm:$0xf0] }
  0xe1   :  { %1773 = vmatpush.bf16.msra.mxu2 %v3896_v14  ;;  %1786 = vmatpush.bf16.msra.mxu3 %v4024_v19  ;;  %v4975_v14 = vld [vmem:[#allocation4 + $0xac] sm:$0xf0] }
  0xe2   :  { %1748 = vmatpush.bf16.msra.mxu0 %v3624_v28  ;;  %v4172_v19 = vor.u32 %v4975_v14, %v4171_v13  ;;  %v4139_v28 = vld [vmem:[#allocation4 + $0x60] sm:$0xf]  ;;  %v4973_v13 = vld [vmem:[#allocation4 + $0xa4] sm:$0xf]  ;;  %v4173_v14 = vld [vmem:[#allocation4 + $0xb0] sm:$0xf0] }
  0xe3   :  { %1761 = vmatpush.bf16.msra.mxu1 %v3752_v31  ;;  %v4999_v31 = vld [vmem:[#allocation4 + $0x16c] sm:$0xf0] }
  0xe4   :  { %v4268_v33 = vor.u32 %v4999_v31, %v4267_v30  ;;  %v4160_v31 = vor.u32 %v4969_v24, %v4157_v25  ;;  %v4195_v24 = vld [vmem:[#allocation4 + $0xc8] sm:$0xf] }
  0xe5   :  { %1774 = vmatpush.bf16.msra.mxu2 %v3880_v32  ;;  %1787 = vmatpush.bf16.msra.mxu3 %v4008_v36 }
  0xe6   :  { %1749 = vmatpush.bf16.msra.mxu0 %v3608_v45  ;;  %v4252_v45 = vor.u32 %v4995_v39, %v4251_v38  ;;  %v4997_v38 = vld [vmem:[#allocation4 + $0x164] sm:$0xf]  ;;  %v4269_v39 = vld [vmem:[#allocation4 + $0x170] sm:$0xf0] }
  0xe7   :  { %1762 = vmatpush.bf16.msra.mxu1 %v3736_v47  ;;  %v4959_v47 = vld [vmem:[#allocation4 + $0x2c] sm:$0xf0] }
  0xe8   :  { %v4108_v51 = vor.u32 %v4959_v47, %v4107_v46  ;;  %v4272_v47 = vor.u32 %v4997_v38, %v4269_v39  ;;  %v4443_v38 = vld [vmem:[#allocation4 + $0x2c0] sm:$0xf]  ;;  %v5043_v39 = vld [vmem:[#allocation4 + $0x2cc] sm:$0xf0] }
  0xe9   :  { %1775 = vmatpush.bf16.msra.mxu2 %v3864_v48  ;;  %1788 = vmatpush.bf16.msra.mxu3 %v3992_v53  ;;  %v4091_v53 = vld [vmem:[#allocation4] sm:$0xf] }
  0xea   :  { %1750 = vmatpush.bf16.msra.mxu0 %v3592_v60  ;;  %v5013_v60 = vld [vmem:[#allocation4 + $0x1e4] sm:$0xf] }
  0xeb   :  { %1763 = vmatpush.bf16.msra.mxu1 %v3720_v0  ;;  %v1557_v29 = vpop.f32.mrf.mxu1  ;;  %v4092_v0 = vor.u32 %v4955_v54, %v4091_v53 }
  0xed   :  { %1776 = vmatpush.bf16.msra.mxu2 %v3848_v1  ;;  %1789 = vmatpush.bf16.msra.mxu3 %v3976_v2  ;;  %v4220_v1 = vor.u32 %v4987_v57, %v4219_v55  ;;  %v4208_v2 = vor.u32 %v4981_v58, %v4205_v21 }
  0xee   :  { %2610 = vmatpush.bf16.msrb.mxu0 %v4204_v3  ;;  %1764 = vmatmul.bf16.vlgmr.msra.gmra.mxu1 %v5245_v40  ;;  %v4156_v40 = vor.u32 %v4971_v23, %v4155_v22  ;;  %v4336_v3 = vor.u32 %v5013_v60, %v4333_v4  ;;  %v4176_v22 = vor.u32 %v4973_v13, %v4173_v14  ;;  %v4109_v60 = vld [vmem:[#allocation4 + $0x30] sm:$0xf0]  ;;  %v4211_v14 = vld [vmem:[#allocation4 + $0xe8] sm:$0xf] }
  0xef   :  { %2623 = vmatpush.bf16.msrb.mxu1 %v4332_v5  ;;  %1751 = vmatmul.bf16.vlgmr.msra.gmra.mxu0 %v5227_v6  ;;  %v4300_v6 = vor.u32 %v5007_v16, %v4299_v15  ;;  %v4977_v5 = vld [vmem:[#allocation4 + $0xc4] sm:$0xf]  ;;  %v4301_v15 = vld [vmem:[#allocation4 + $0x1b0] sm:$0xf0]  ;;  %v1800_v16 = vld [vmem:[#allocation1] sm:$0xff] }
  0xf0   :  { %1777 = vmatmul.bf16.vlgmr.msra.gmra.mxu2 %v5247_v41  ;;  %1790 = vmatmul.bf16.vlgmr.msra.gmra.mxu3 %v5243_v37  ;;  %v1544_v41 = vpop.f32.mrf.mxu0  ;;  %v4967_v37 = vld [vmem:[#allocation4 + $0x6c] sm:$0xf0]  ;;  %v4221_v13 = vld [vmem:[#allocation4 + $0x110] sm:$0xf0] }
  0xf1   :  { %v4140_v32 = vor.u32 %v4967_v37, %v4139_v28  ;;  %v1545_v20 = vadd.f32 %v1544_v41, %v5277_v27  ;;  %v5005_v27 = vld [vmem:[#allocation4 + $0x1a4] sm:$0xf]  ;;  %v1807_v41 = vpack.i.b16 %v1801_v17, %v1801_v17  ;;  %v4285_v28 = vld [vmem:[#allocation4 + $0x190] sm:$0xf0] }
  0xf2   :  { %2611 = vmatpush.bf16.msrb.mxu0 %v4188_v11  ;;  %v4192_v11 = vor.u32 %v4977_v5, %v4189_v7  ;;  %v4304_v23 = vor.u32 %v5005_v27, %v4301_v15  ;;  %v4984_v27 = vld [vmem:[#allocation4 + $0xf4] sm:$0xf0]  ;;  %v4339_v15 = vld [vmem:[#allocation4 + $0x1e8] sm:$0xf] }
  0xf3   :  { %2624 = vmatpush.bf16.msrb.mxu1 %v4316_v12  ;;  %v1570_v36 = vpop.f32.mrf.mxu2  ;;  %v1583_v42 = vpop.f32.mrf.mxu3  ;;  %v1558_v10 = vadd.f32 %v1557_v29, %v1545_v20  ;;  %v4320_v12 = vor.u32 %v5009_v8, %v4317_v9  ;;  %v1809_v34 = vperm.slane %v1807_v41, 0  ;;  %v4323_v41 = vld [vmem:[#allocation4 + $0x1c8] sm:$0xf] }
  0xf4   :  { %v1559_v48 = vpop.f32.mrf.mxu1 }
  0xf5   :  { %v1821_v46 = vunpack.c.l.bf16 %v1809_v34  ;;  %v4961_v48 = vld [vmem:[#allocation4 + $0x44] sm:$0xf]  ;;  %v4976_v34 = vld [vmem:[#allocation4 + $0xb4] sm:$0xf0] }
  0xf6   :  { %2612 = vmatpush.bf16.msrb.mxu0 %v4172_v19  ;;  %v1493_v19 = vadd.f32 %v5271_v61, %v5265_v62  ;;  %v4128_v55 = vor.u32 %v4961_v48, %v4125_v49  ;;  %v4972_v48 = vld [vmem:[#allocation4 + $0x94] sm:$0xf0]  ;;  %v4291_v49 = vld [vmem:[#allocation4 + $0x188] sm:$0xf] }
  0xf7   :  { %2625 = vmatpush.bf16.msrb.mxu1 %v4300_v6  ;;  %v1571_v6 = vadd.f32 %v1570_v36, %v1558_v10  ;;  %v4141_v36 = vld [vmem:[#allocation4 + $0x70] sm:$0xf0]  ;;  %v4953_v10 = vld [vmem:[#allocation4 + $0x4] sm:$0xf] }
  0xf8   :  { %v1546_v44 = vpop.f32.mrf.mxu0  ;;  %v1506_v37 = vadd.f32 %v5273_v63, %v1493_v19 }
  0xf9   :  { %v1584_v29 = vadd.f32 %v1583_v42, %v1571_v6 }
  0xfa   :  { %2613 = vmatpush.bf16.msrb.mxu0 %v4156_v40  ;;  %v1804_v40 = vpack.i.b16 %v1800_v16, %v1800_v16  ;;  %v5016_v16 = vld [vmem:[#allocation4 + $0x1f4] sm:$0xf0] }
  0xfb   :  { %2626 = vmatpush.bf16.msrb.mxu1 %v4284_v26  ;;  %v1572_v56 = vpop.f32.mrf.mxu2  ;;  %v1585_v59 = vpop.f32.mrf.mxu3  ;;  %v5001_v26 = vld [vmem:[#allocation4 + $0x184] sm:$0xf]  ;;  %v4340_v25 = vor.u32 %v5016_v16, %v4339_v15  ;;  %v4996_v15 = vld [vmem:[#allocation4 + $0x154] sm:$0xf0]  ;;  %v4395_v16 = vld [vmem:[#allocation4 + $0x260] sm:$0xf] }
  0xfc   :  { %v4288_v62 = vor.u32 %v5001_v26, %v4285_v28  ;;  %v4957_v59 = vld [vmem:[#allocation4 + $0x24] sm:$0xf]  ;;  %v5012_v26 = vld [vmem:[#allocation4 + $0x1d4] sm:$0xf0]  ;;  %v4459_v28 = vld [vmem:[#allocation4 + $0x2e0] sm:$0xf] }
  0xfd   :  { %v4112_v5 = vor.u32 %v4957_v59, %v4109_v60  ;;  %v4275_v59 = vld [vmem:[#allocation4 + $0x168] sm:$0xf]  ;;  %v5000_v60 = vld [vmem:[#allocation4 + $0x174] sm:$0xf0] }
  0xfe   :  { %2614 = vmatpush.bf16.msrb.mxu0 %v4140_v32 }
  0xff   :  { %2627 = vmatpush.bf16.msrb.mxu1 %v4268_v33  ;;  %v1806_v33 = vperm.slane %v1804_v40, 0  ;;  %v4980_v40 = vld [vmem:[#allocation4 + $0xd4] sm:$0xf0] }
 0x101   :  { %v1820_v42 = vunpack.c.l.bf16 %v1806_v33  ;;  %v4324_v33 = vor.u32 %v5012_v26, %v4323_v41 }
 0x102   :  { %2615 = vmatpush.bf16.msrb.mxu0 %v4124_v43  ;;  %v1519_v43 = vadd.f32 %v5275_v18, %v1506_v37  ;;  %v5047_v37 = vld [vmem:[#allocation4 + $0x2ec] sm:$0xf0] }
 0x103   :  { %2628 = vmatpush.bf16.msrb.mxu1 %v4252_v45  ;;  %v4144_v45 = vor.u32 %v4965_v35, %v4141_v36  ;;  %v4307_v35 = vld [vmem:[#allocation4 + $0x1a8] sm:$0xf]  ;;  %v5008_v36 = vld [vmem:[#allocation4 + $0x1b4] sm:$0xf0] }
 0x106   :  { %2616 = vmatpush.bf16.msrb.mxu0 %v4108_v51  ;;  %v4253_v51 = vld [vmem:[#allocation4 + $0x150] sm:$0xf0] }
 0x107   :  { %2629 = vmatpush.bf16.msrb.mxu1 %v4236_v52  ;;  %v4256_v21 = vor.u32 %v4993_v50, %v4253_v51  ;;  %v5004_v50 = vld [vmem:[#allocation4 + $0x194] sm:$0xf0]  ;;  %v4427_v51 = vld [vmem:[#allocation4 + $0x2a0] sm:$0xf] }
 0x10a   :  { %2617 = vmatpush.bf16.msrb.mxu0 %v4092_v0  ;;  %v4989_v0 = vld [vmem:[#allocation4 + $0x124] sm:$0xf] }
 0x10b   :  { %2630 = vmatpush.bf16.msrb.mxu1 %v4220_v1  ;;  %v1609_v61 = vpop.f32.mrf.mxu1  ;;  %v4237_v1 = vld [vmem:[#allocation4 + $0x130] sm:$0xf0] }
 0x10c   :  { %v1596_v30 = vpop.f32.mrf.mxu0  ;;  %v4240_v7 = vor.u32 %v4989_v0, %v4237_v1  ;;  %v4411_v0 = vld [vmem:[#allocation4 + $0x280] sm:$0xf]  ;;  %v5035_v1 = vld [vmem:[#allocation4 + $0x28c] sm:$0xf0] }
 0x10d   :  { %v1597_v32 = vadd.f32 %v1596_v30, %v1584_v29  ;;  %v4587_v29 = vld [vmem:[#allocation4 + $0x3e0] sm:$0xf]  ;;  %v4460_v30 = vor.u32 %v5047_v37, %v4459_v28  ;;  %v4960_v28 = vld [vmem:[#allocation4 + $0x34] sm:$0xf0]  ;;  %v4243_v37 = vld [vmem:[#allocation4 + $0x128] sm:$0xf] }
 0x10e   :  { %2662 = vmatpush.bf16.msra.mxu0 %v4208_v2 }
 0x10f   :  { %2675 = vmatpush.bf16.msra.mxu1 %v4336_v3  ;;  %v1610_v44 = vadd.f32 %v1609_v61, %v1597_v32  ;;  %v4196_v32 = vor.u32 %v4980_v40, %v4195_v24  ;;  %2636 = vmatpush.bf16.msrb.mxu2 %v4460_v30  ;;  %v4115_v40 = vld [vmem:[#allocation4 + $0x28] sm:$0xf] }
 0x111   :  { %v1795_v63 = vpack.c.bf16 %v1610_v44, %v1519_v43  ;;  %v4571_v43 = vld [vmem:[#allocation4 + $0x3c0] sm:$0xf]  ;;  %v4444_v44 = vor.u32 %v5043_v39, %v4443_v38  ;;  %v4956_v38 = vld [vmem:[#allocation4 + $0x14] sm:$0xf0]  ;;  %v4227_v39 = vld [vmem:[#allocation4 + $0x108] sm:$0xf] }
 0x112   :  { %2663 = vmatpush.bf16.msra.mxu0 %v4192_v11  ;;  %v4093_v11 = vld [vmem:[#allocation4 + $0x10] sm:$0xf0] }
 0x113   :  { %2676 = vmatpush.bf16.msra.mxu1 %v4320_v12  ;;  %v1816_v52 = vunpack.c.l.bf16 %v1795_v63  ;;  %v1817_v53 = vunpack.c.h.bf16 %v1795_v63  ;;  %v1622_v54 = vpop.f32.mrf.mxu2  ;;  %v1635_v56 = vpop.f32.mrf.mxu3  ;;  %v4985_v12 = vld [vmem:[#allocation4 + $0x104] sm:$0xf]  ;;  %v4096_v19 = vor.u32 %v4953_v10, %v4093_v11  ;;  %2637 = vmatpush.bf16.msrb.mxu2 %v4444_v44  ;;  %v4131_v11 = vld [vmem:[#allocation4 + $0x48] sm:$0xf] }
 0x114   :  { %v1598_v57 = vpop.f32.mrf.mxu0  ;;  %v5291_v4 = vadd.f32 %v1635_v56, %v1622_v54  ;;  %v1611_v20 = vpop.f32.mrf.mxu1 }
 0x115   :  { %v1824_v18 = vadd.f32 %v1820_v42, %v1816_v52  ;;  %v1825_v58 = vadd.f32 %v1821_v46, %v1817_v53  ;;  %v4163_v42 = vld [vmem:[#allocation4 + $0x88] sm:$0xf]  ;;  %v5039_v52 = vld [vmem:[#allocation4 + $0x2ac] sm:$0xf0]  ;;  %v4555_v53 = vld [vmem:[#allocation4 + $0x3a0] sm:$0xf] }
 0x116   :  { %2664 = vmatpush.bf16.msra.mxu0 %v4176_v22  ;;  %v4224_v22 = vor.u32 %v4985_v12, %v4221_v13  ;;  %v4428_v54 = vor.u32 %v5039_v52, %v4427_v51  ;;  %v4164_v56 = vor.u32 %v4972_v48, %v4163_v42  ;;  %v4147_v57 = vld [vmem:[#allocation4 + $0x68] sm:$0xf]  ;;  %v4276_v13 = vor.u32 %v5000_v60, %v4275_v59  ;;  %v4213_v42 = vld [vmem:[#allocation4 + $0xf8] sm:$0xf0]  ;;  %v4491_v48 = vld [vmem:[#allocation4 + $0x320] sm:$0xf] }
 0x117   :  { %2677 = vmatpush.bf16.msra.mxu1 %v4304_v23  ;;  %v1834_v2 = vmax.f32 %v1824_v18, 0.0  ;;  %v1835_v3 = vmax.f32 %v1825_v58, 0.0  ;;  %v4212_v23 = vor.u32 %v4984_v27, %v4211_v14  ;;  %v4292_v58 = vor.u32 %v5004_v50, %v4291_v49  ;;  %v4964_v14 = vld [vmem:[#allocation4 + $0x54] sm:$0xf0]  ;;  %v4259_v27 = vld [vmem:[#allocation4 + $0x148] sm:$0xf] }
 0x118   :  { %2638 = vmatpush.bf16.msrb.mxu2 %v4428_v54  ;;  %v4132_v24 = vor.u32 %v4964_v14, %v4131_v11  ;;  %v4260_v26 = vor.u32 %v4996_v15, %v4259_v27  ;;  %v5014_v49 = vld [vmem:[#allocation4 + $0x1ec] sm:$0xf]  ;;  %v4341_v50 = vld [vmem:[#allocation4 + $0x1f8] sm:$0xf0]  ;;  %v5045_v11 = vld [vmem:[#allocation4 + $0x2e4] sm:$0xf] }
 0x119   :  { %v5293_v8 = vpack.c.bf16 %v1834_v2, %v1834_v2  ;;  %v5295_v9 = vpack.c.bf16 %v1835_v3, %v1835_v3  ;;  %v4539_v2 = vld [vmem:[#allocation4 + $0x380] sm:$0xf]  ;;  %v5010_v59 = vld [vmem:[#allocation4 + $0x1cc] sm:$0xf]  ;;  %v4325_v60 = vld [vmem:[#allocation4 + $0x1d8] sm:$0xf0] }
 0x11a   :  { %2665 = vmatpush.bf16.msra.mxu0 %v4160_v31  ;;  %v5079_v31 = vld [vmem:[#allocation4 + $0x3ec] sm:$0xf0]  ;;  %v5077_v27 = vld [vmem:[#allocation4 + $0x3e4] sm:$0xf]  ;;  %v4589_v15 = vld [vmem:[#allocation4 + $0x3f0] sm:$0xf0] }
 0x11b   :  { %2678 = vmatpush.bf16.msra.mxu1 %v4288_v62  ;;  %2618 = vmatmul.bf16.vlgmr.msrb.gmra.mxu0 %v5293_v8  ;;  %v1624_v17 = vpop.f32.mrf.mxu2  ;;  %v1637_v6 = vpop.f32.mrf.mxu3  ;;  %v4179_v62 = vld [vmem:[#allocation4 + $0xa8] sm:$0xf]  ;;  %v4588_v61 = vor.u32 %v5079_v31, %v4587_v29  ;;  %v4992_v29 = vld [vmem:[#allocation4 + $0x134] sm:$0xf0]  ;;  %v4379_v31 = vld [vmem:[#allocation4 + $0x240] sm:$0xf] }
 0x11c   :  { %2631 = vmatmul.bf16.vlgmr.msrb.gmra.mxu1 %v5295_v9  ;;  %v4180_v63 = vor.u32 %v4976_v34, %v4179_v62  ;;  %v5031_v17 = vld [vmem:[#allocation4 + $0x26c] sm:$0xf0]  ;;  %v4507_v62 = vld [vmem:[#allocation4 + $0x340] sm:$0xf]  ;;  %v4244_v44 = vor.u32 %v4992_v29, %v4243_v37  ;;  %v4309_v37 = vld [vmem:[#allocation4 + $0x1b8] sm:$0xf0] }
 0x11d   :  { %2649 = vmatpush.bf16.msrb.mxu3 %v4588_v61  ;;  %v5059_v34 = vld [vmem:[#allocation4 + $0x34c] sm:$0xf0] }
 0x11e   :  { %2666 = vmatpush.bf16.msra.mxu0 %v4144_v45  ;;  %v5075_v45 = vld [vmem:[#allocation4 + $0x3cc] sm:$0xf0] }
 0x11f   :  { %2679 = vmatpush.bf16.msra.mxu1 %v4272_v47  ;;  %v4572_v46 = vor.u32 %v5075_v45, %v4571_v43  ;;  %v4308_v47 = vor.u32 %v5008_v36, %v4307_v35  ;;  %v4116_v35 = vor.u32 %v4960_v28, %v4115_v40  ;;  %v4099_v36 = vld [vmem:[#allocation4 + $0x8] sm:$0xf]  ;;  %v4508_v43 = vor.u32 %v5059_v34, %v4507_v62  ;;  %v4988_v45 = vld [vmem:[#allocation4 + $0x114] sm:$0xf0]  ;;  %v4181_v40 = vld [vmem:[#allocation4 + $0xb8] sm:$0xf0] }
 0x120   :  { %v4100_v54 = vor.u32 %v4956_v38, %v4099_v36  ;;  %v5006_v28 = vld [vmem:[#allocation4 + $0x1ac] sm:$0xf]  ;;  %v4293_v34 = vld [vmem:[#allocation4 + $0x198] sm:$0xf0]  ;;  %v4429_v36 = vld [vmem:[#allocation4 + $0x2b0] sm:$0xf0] }
 0x121   :  { %2650 = vmatpush.bf16.msrb.mxu3 %v4572_v46  ;;  %v4363_v46 = vld [vmem:[#allocation4 + $0x220] sm:$0xf]  ;;  %v4312_v62 = vor.u32 %v5006_v28, %v4309_v37  ;;  %v5069_v38 = vld [vmem:[#allocation4 + $0x3a4] sm:$0xf]  ;;  %v4954_v37 = vld [vmem:[#allocation4 + $0xc] sm:$0xf] }
 0x122   :  { %2667 = vmatpush.bf16.msra.mxu0 %v4128_v55  ;;  %v5071_v55 = vld [vmem:[#allocation4 + $0x3ac] sm:$0xf0] }
 0x123   :  { %2680 = vmatpush.bf16.msra.mxu1 %v4256_v21  ;;  %v4556_v18 = vor.u32 %v5071_v55, %v4555_v53  ;;  %v4968_v21 = vld [vmem:[#allocation4 + $0x74] sm:$0xf0]  ;;  %v5055_v53 = vld [vmem:[#allocation4 + $0x32c] sm:$0xf0]  ;;  %v4978_v55 = vld [vmem:[#allocation4 + $0xcc] sm:$0xf] }
 0x124   :  { %v4148_v10 = vor.u32 %v4968_v21, %v4147_v57  ;;  %v4492_v57 = vor.u32 %v5055_v53, %v4491_v48  ;;  %v4197_v21 = vld [vmem:[#allocation4 + $0xd8] sm:$0xf0] }
 0x125   :  { %2651 = vmatpush.bf16.msrb.mxu3 %v4556_v18  ;;  %v4228_v18 = vor.u32 %v4988_v45, %v4227_v39  ;;  %v4966_v45 = vld [vmem:[#allocation4 + $0x6c] sm:$0xf]  ;;  %v4277_v48 = vld [vmem:[#allocation4 + $0x178] sm:$0xf0] }
 0x126   :  { %2668 = vmatpush.bf16.msra.mxu0 %v4112_v5  ;;  %v4412_v5 = vor.u32 %v5035_v1, %v4411_v0  ;;  %v4344_v0 = vor.u32 %v5014_v49, %v4341_v50  ;;  %v4347_v1 = vld [vmem:[#allocation4 + $0x200] sm:$0xf]  ;;  %v5033_v50 = vld [vmem:[#allocation4 + $0x284] sm:$0xf] }
 0x127   :  { %2681 = vmatpush.bf16.msra.mxu1 %v4240_v7  ;;  %v5067_v7 = vld [vmem:[#allocation4 + $0x38c] sm:$0xf0] }
 0x128   :  { %v4540_v12 = vor.u32 %v5067_v7, %v4539_v2  ;;  %2639 = vmatpush.bf16.msrb.mxu2 %v4412_v5  ;;  %v5019_v2 = vld [vmem:[#allocation4 + $0x20c] sm:$0xf0]  ;;  %v4475_v5 = vld [vmem:[#allocation4 + $0x300] sm:$0xf] }
 0x129   :  { %v4348_v7 = vor.u32 %v5019_v2, %v4347_v1  ;;  %v4397_v1 = vld [vmem:[#allocation4 + $0x270] sm:$0xf0]  ;;  %v5061_v2 = vld [vmem:[#allocation4 + $0x364] sm:$0xf] }
 0x12a   :  { %2669 = vmatpush.bf16.msra.mxu0 %v4096_v19  ;;  %v4523_v19 = vld [vmem:[#allocation4 + $0x360] sm:$0xf]  ;;  %2652 = vmatpush.bf16.msrb.mxu3 %v4540_v12  ;;  %v4461_v12 = vld [vmem:[#allocation4 + $0x2f0] sm:$0xf0] }
 0x12b   :  { %2682 = vmatpush.bf16.msra.mxu1 %v4224_v22  ;;  %v5303_v3 = vpop.f32.mrf.mxu1  ;;  %v4396_v22 = vor.u32 %v5031_v17, %v4395_v16  ;;  %v4464_v14 = vor.u32 %v5045_v11, %v4461_v12  ;;  %v4200_v16 = vor.u32 %v4978_v55, %v4197_v21  ;;  %v4974_v17 = vld [vmem:[#allocation4 + $0xac] sm:$0xf]  ;;  %v4133_v21 = vld [vmem:[#allocation4 + $0x58] sm:$0xf0] }
 0x12c   :  { %v5301_v20 = vpop.f32.mrf.mxu0  ;;  %v4958_v11 = vld [vmem:[#allocation4 + $0x2c] sm:$0xf] }
 0x12d   :  { %2670 = vmatmul.bf16.vlgmr.msra.gmra.mxu0 %v5293_v8  ;;  %2640 = vmatpush.bf16.msrb.mxu2 %v4396_v22  ;;  %v5041_v22 = vld [vmem:[#allocation4 + $0x2c4] sm:$0xf] }
 0x12e   :  { %2714 = vmatpush.bf16.msrb.mxu0 %v4212_v23  ;;  %2683 = vmatmul.bf16.vlgmr.msra.gmra.mxu1 %v5295_v9  ;;  %v5063_v23 = vld [vmem:[#allocation4 + $0x36c] sm:$0xf0] }
 0x12f   :  { %2727 = vmatpush.bf16.msrb.mxu1 %v4340_v25  ;;  %v4524_v41 = vor.u32 %v5063_v23, %v4523_v19  ;;  %v4592_v19 = vor.u32 %v5077_v27, %v4589_v15  ;;  %v4445_v23 = vld [vmem:[#allocation4 + $0x2d0] sm:$0xf0]  ;;  %v4117_v15 = vld [vmem:[#allocation4 + $0x38] sm:$0xf0] }
 0x130   :  { %v4448_v29 = vor.u32 %v5041_v22, %v4445_v23  ;;  %v5025_v22 = vld [vmem:[#allocation4 + $0x244] sm:$0xf]  ;;  %v4381_v23 = vld [vmem:[#allocation4 + $0x250] sm:$0xf0] }
 0x131   :  { %2653 = vmatpush.bf16.msrb.mxu3 %v4524_v41  ;;  %v5073_v41 = vld [vmem:[#allocation4 + $0x3c4] sm:$0xf] }
 0x132   :  { %2715 = vmatpush.bf16.msrb.mxu0 %v4196_v32  ;;  %v5027_v32 = vld [vmem:[#allocation4 + $0x24c] sm:$0xf0] }
 0x133   :  { %2728 = vmatpush.bf16.msrb.mxu1 %v4324_v33  ;;  %v5305_v6 = vpop.f32.mrf.mxu2  ;;  %v5307_v25 = vpop.f32.mrf.mxu3  ;;  %v4380_v33 = vor.u32 %v5027_v32, %v4379_v31  ;;  %v4970_v31 = vld [vmem:[#allocation4 + $0x8c] sm:$0xf] }
 0x134   :  { %v1650_v30 = vpop.f32.mrf.mxu0  ;;  %v1663_v61 = vpop.f32.mrf.mxu1 }
 0x135   :  { %2641 = vmatpush.bf16.msrb.mxu2 %v4380_v33  ;;  %2654 = vmatpush.bf16.msrb.mxu3 %v4508_v43  ;;  %v4184_v30 = vor.u32 %v4974_v17, %v4181_v40  ;;  %v4165_v61 = vld [vmem:[#allocation4 + $0x98] sm:$0xf0]  ;;  %v5002_v33 = vld [vmem:[#allocation4 + $0x18c] sm:$0xf]  ;;  %v4557_v43 = vld [vmem:[#allocation4 + $0x3b0] sm:$0xf0]  ;;  %v4384_v40 = vor.u32 %v5025_v22, %v4381_v23 }
 0x136   :  { %2716 = vmatpush.bf16.msrb.mxu0 %v4180_v63  ;;  %v4982_v63 = vld [vmem:[#allocation4 + $0xec] sm:$0xf]  ;;  %v4245_v17 = vld [vmem:[#allocation4 + $0x138] sm:$0xf0]  ;;  %v4595_v23 = vld [vmem:[#allocation4 + $0x3e8] sm:$0xf] }
 0x137   :  { %2729 = vmatpush.bf16.msrb.mxu1 %v4308_v47  ;;  %v5023_v47 = vld [vmem:[#allocation4 + $0x22c] sm:$0xf0] }
 0x138   :  { %v4364_v52 = vor.u32 %v5023_v47, %v4363_v46  ;;  %v4149_v46 = vld [vmem:[#allocation4 + $0x78] sm:$0xf0]  ;;  %v4998_v47 = vld [vmem:[#allocation4 + $0x16c] sm:$0xf] }
 0x139   :  { %2655 = vmatpush.bf16.msrb.mxu3 %v4492_v57  ;;  %v4152_v55 = vor.u32 %v4966_v45, %v4149_v46  ;;  %v4962_v57 = vld [vmem:[#allocation4 + $0x4c] sm:$0xf]  ;;  %v2820_v46 = vld [vmem:[%s5457_s4] sm:$0xf] }
 0x13a   :  { %2717 = vmatpush.bf16.msrb.mxu0 %v4164_v56  ;;  %2642 = vmatpush.bf16.msrb.mxu2 %v4364_v52  ;;  %v5065_v52 = vld [vmem:[#allocation4 + $0x384] sm:$0xf] }
 0x13b   :  { %2730 = vmatpush.bf16.msrb.mxu1 %v4292_v58  ;;  %v1676_v51 = vpop.f32.mrf.mxu2  ;;  %v1689_v56 = vpop.f32.mrf.mxu3  ;;  %v4216_v58 = vor.u32 %v4982_v63, %v4213_v42  ;;  %v4560_v63 = vor.u32 %v5069_v38, %v4557_v43  ;;  %v4296_v42 = vor.u32 %v5002_v33, %v4293_v34  ;;  %v4365_v33 = vld [vmem:[#allocation4 + $0x230] sm:$0xf0]  ;;  %v5053_v34 = vld [vmem:[#allocation4 + $0x324] sm:$0xf] }
 0x13c   :  { %v4413_v51 = vld [vmem:[#allocation4 + $0x290] sm:$0xf0] }
 0x13d   :  { %v4416_v53 = vor.u32 %v5033_v50, %v4413_v51  ;;  %v1803_v43 = vld [vmem:[#allocation1 + $0x1b] sm:$0xff]  ;;  %v5049_v50 = vld [vmem:[#allocation4 + $0x304] sm:$0xf] }
 0x13e   :  { %2718 = vmatpush.bf16.msrb.mxu0 %v4148_v10  ;;  %v5051_v10 = vld [vmem:[#allocation4 + $0x30c] sm:$0xf0]  ;;  %2643 = vmatpush.bf16.msrb.mxu2 %v4348_v7  ;;  %v4525_v7 = vld [vmem:[#allocation4 + $0x370] sm:$0xf0] }
 0x13f   :  { %2731 = vmatpush.bf16.msrb.mxu1 %v4276_v13  ;;  %v4476_v13 = vor.u32 %v5051_v10, %v4475_v5  ;;  %v4136_v10 = vor.u32 %v4962_v57, %v4133_v21  ;;  %v4528_v12 = vor.u32 %v5061_v2, %v4525_v7  ;;  %v4477_v51 = vld [vmem:[#allocation4 + $0x310] sm:$0xf0] }
 0x141   :  { %2656 = vmatpush.bf16.msrb.mxu3 %v4476_v13 }
 0x142   :  { %2719 = vmatpush.bf16.msrb.mxu0 %v4132_v24  ;;  %v4328_v24 = vor.u32 %v5010_v59, %v4325_v60  ;;  %2688 = vmatpush.bf16.msra.mxu2 %v4464_v14  ;;  %v4994_v59 = vld [vmem:[#allocation4 + $0x14c] sm:$0xf]  ;;  %v4261_v60 = vld [vmem:[#allocation4 + $0x158] sm:$0xf0] }
 0x143   :  { %2732 = vmatpush.bf16.msrb.mxu1 %v4260_v26  ;;  %v4573_v26 = vld [vmem:[#allocation4 + $0x3d0] sm:$0xf0]  ;;  %v4264_v13 = vor.u32 %v4994_v59, %v4261_v60 }
 0x144   :  { %v4576_v32 = vor.u32 %v5073_v41, %v4573_v26  ;;  %v4509_v41 = vld [vmem:[#allocation4 + $0x350] sm:$0xf0]  ;;  %v4120_v26 = vor.u32 %v4958_v11, %v4117_v15 }
 0x145   :  { %2701 = vmatpush.bf16.msra.mxu3 %v4592_v19 }
 0x146   :  { %2720 = vmatpush.bf16.msrb.mxu0 %v4116_v35  ;;  %v5037_v35 = vld [vmem:[#allocation4 + $0x2a4] sm:$0xf]  ;;  %2689 = vmatpush.bf16.msra.mxu2 %v4448_v29 }
 0x147   :  { %2733 = vmatpush.bf16.msrb.mxu1 %v4244_v44  ;;  %v4432_v39 = vor.u32 %v5037_v35, %v4429_v36  ;;  %v4168_v44 = vor.u32 %v4970_v31, %v4165_v61  ;;  %v4101_v31 = vld [vmem:[#allocation4 + $0x18] sm:$0xf0]  ;;  %v5021_v61 = vld [vmem:[#allocation4 + $0x224] sm:$0xf]  ;;  %v4493_v36 = vld [vmem:[#allocation4 + $0x330] sm:$0xf0] }
 0x148   :  { %v4368_v35 = vor.u32 %v5021_v61, %v4365_v33  ;;  %v4104_v38 = vor.u32 %v4954_v37, %v4101_v31  ;;  %v4451_v37 = vld [vmem:[#allocation4 + $0x2c8] sm:$0xf] }
 0x149   :  { %2702 = vmatpush.bf16.msra.mxu3 %v4576_v32  ;;  %v4986_v32 = vld [vmem:[#allocation4 + $0x10c] sm:$0xf]  ;;  %v4579_v31 = vld [vmem:[#allocation4 + $0x3c8] sm:$0xf] }
 0x14a   :  { %2721 = vmatpush.bf16.msrb.mxu0 %v4100_v54  ;;  %2690 = vmatpush.bf16.msra.mxu2 %v4432_v39  ;;  %v4541_v54 = vld [vmem:[#allocation4 + $0x390] sm:$0xf0]  ;;  %v1802_v39 = vld [vmem:[#allocation1 + $0x12] sm:$0xff] }
 0x14b   :  { %2734 = vmatpush.bf16.msrb.mxu1 %v4228_v18  ;;  %v5313_v56 = vpop.f32.mrf.mxu1  ;;  %v4544_v18 = vor.u32 %v5065_v52, %v4541_v54  ;;  %2822 = vst [vmem:[#allocation1] ss:$9 sm:$0xff] %v2820_v46  ;;  %v1649_v54 = vadd.f32 %v5301_v20, %v5291_v4  ;;  %v4435_v33 = vld [vmem:[#allocation4 + $0x2a8] sm:$0xf] }
 0x14c   :  { %v5311_v49 = vpop.f32.mrf.mxu0 }
 0x14d   :  { %2722 = vmatmul.bf16.vlgmr.msrb.gmra.mxu0 %v5293_v8  ;;  %2703 = vmatpush.bf16.msra.mxu3 %v4560_v63  ;;  %v1662_v57 = vadd.f32 %v5303_v3, %v1649_v54  ;;  %v4387_v54 = vld [vmem:[#allocation4 + $0x248] sm:$0xf] }
 0x14e   :  { %2766 = vmatpush.bf16.msra.mxu0 %v4216_v58  ;;  %2735 = vmatmul.bf16.vlgmr.msrb.gmra.mxu1 %v5295_v9  ;;  %v4280_v58 = vor.u32 %v4998_v47, %v4277_v48  ;;  %v5017_v47 = vld [vmem:[#allocation4 + $0x204] sm:$0xf]  ;;  %v4349_v48 = vld [vmem:[#allocation4 + $0x210] sm:$0xf0] }
 0x14f   :  { %2779 = vmatpush.bf16.msra.mxu1 %v4344_v0  ;;  %v5029_v0 = vld [vmem:[#allocation4 + $0x264] sm:$0xf]  ;;  %2691 = vmatpush.bf16.msra.mxu2 %v4416_v53  ;;  %v4352_v52 = vor.u32 %v5017_v47, %v4349_v48  ;;  %v4480_v53 = vor.u32 %v5049_v50, %v4477_v51  ;;  %v1675_v60 = vadd.f32 %v5305_v6, %v1662_v57  ;;  %v4403_v47 = vld [vmem:[#allocation4 + $0x268] sm:$0xf]  ;;  %v5032_v48 = vld [vmem:[#allocation4 + $0x274] sm:$0xf0] }
 0x150   :  { %v4400_v5 = vor.u32 %v5029_v0, %v4397_v1  ;;  %v1810_v0 = vpack.i.b16 %v1802_v39, %v1802_v39  ;;  %v1813_v1 = vpack.i.b16 %v1803_v43, %v1803_v43  ;;  %v4419_v43 = vld [vmem:[#allocation4 + $0x288] sm:$0xf]  ;;  %v5064_v51 = vld [vmem:[#allocation4 + $0x374] sm:$0xf0] }
 0x151   :  { %2704 = vmatpush.bf16.msra.mxu3 %v4544_v18  ;;  %v4531_v50 = vld [vmem:[#allocation4 + $0x368] sm:$0xf] }
 0x152   :  { %2767 = vmatpush.bf16.msra.mxu0 %v4200_v16  ;;  %v4990_v16 = vld [vmem:[#allocation4 + $0x12c] sm:$0xf]  ;;  %v1815_v4 = vperm.slane %v1813_v1, 0  ;;  %v4515_v57 = vld [vmem:[#allocation4 + $0x348] sm:$0xf] }
 0x153   :  { %2780 = vmatpush.bf16.msra.mxu1 %v4328_v24  ;;  %v1726_v14 = vpop.f32.mrf.mxu2  ;;  %v1739_v27 = vpop.f32.mrf.mxu3  ;;  %v5057_v24 = vld [vmem:[#allocation4 + $0x344] sm:$0xf]  ;;  %2692 = vmatpush.bf16.msra.mxu2 %v4400_v5  ;;  %v5056_v1 = vld [vmem:[#allocation4 + $0x334] sm:$0xf0] }
 0x154   :  { %v1702_v19 = vpop.f32.mrf.mxu0  ;;  %v1715_v28 = vpop.f32.mrf.mxu1  ;;  %v4512_v29 = vor.u32 %v5057_v24, %v4509_v41  ;;  %v5080_v24 = vld [vmem:[#allocation4 + $0x3f4] sm:$0xf0] }
 0x155   :  { %2705 = vmatpush.bf16.msra.mxu3 %v4528_v12  ;;  %v4596_v28 = vor.u32 %v5080_v24, %v4595_v23  ;;  %v5038_v24 = vld [vmem:[#allocation4 + $0x2ac] sm:$0xf] }
 0x156   :  { %2768 = vmatpush.bf16.msra.mxu0 %v4184_v30  ;;  %v4248_v30 = vor.u32 %v4990_v16, %v4245_v17  ;;  %v4467_v16 = vld [vmem:[#allocation4 + $0x2e8] sm:$0xf] }
 0x157   :  { %2781 = vmatpush.bf16.msra.mxu1 %v4312_v62  ;;  %v4229_v62 = vld [vmem:[#allocation4 + $0x118] sm:$0xf0]  ;;  %2693 = vmatpush.bf16.msra.mxu2 %v4384_v40 }
 0x158   :  { %v4232_v45 = vor.u32 %v4986_v32, %v4229_v62  ;;  %v5076_v32 = vld [vmem:[#allocation4 + $0x3d4] sm:$0xf0] }
 0x159   :  { %2706 = vmatpush.bf16.msra.mxu3 %v4512_v29  ;;  %v4580_v61 = vor.u32 %v5076_v32, %v4579_v31  ;;  %v4421_v31 = vld [vmem:[#allocation4 + $0x298] sm:$0xf0]  ;;  %v5066_v32 = vld [vmem:[#allocation4 + $0x38c] sm:$0xf] }
 0x15a   :  { %2769 = vmatpush.bf16.msra.mxu0 %v4168_v44  ;;  %v4496_v44 = vor.u32 %v5053_v34, %v4493_v36  ;;  %v5040_v34 = vld [vmem:[#allocation4 + $0x2b4] sm:$0xf0] }
 0x15b   :  { %2782 = vmatpush.bf16.msra.mxu1 %v4296_v42  ;;  %v1728_v63 = vpop.f32.mrf.mxu2  ;;  %v1741_v42 = vpop.f32.mrf.mxu3  ;;  %2694 = vmatpush.bf16.msra.mxu2 %v4368_v35  ;;  %v4563_v35 = vld [vmem:[#allocation4 + $0x3a8] sm:$0xf]  ;;  %v5072_v36 = vld [vmem:[#allocation4 + $0x3b4] sm:$0xf0] }
 0x15c   :  { %v4564_v39 = vor.u32 %v5072_v36, %v4563_v35  ;;  %v5068_v63 = vld [vmem:[#allocation4 + $0x394] sm:$0xf0]  ;;  %v5030_v36 = vld [vmem:[#allocation4 + $0x26c] sm:$0xf] }
 0x15d   :  { %2707 = vmatpush.bf16.msra.mxu3 %v4496_v44  ;;  %v5036_v44 = vld [vmem:[#allocation4 + $0x294] sm:$0xf0] }
 0x15e   :  { %2770 = vmatpush.bf16.msra.mxu0 %v4152_v55  ;;  %v1727_v55 = vadd.f32 %v1726_v14, %v5313_v56  ;;  %v1823_v14 = vunpack.c.l.bf16 %v1815_v4  ;;  %v4420_v42 = vor.u32 %v5036_v44, %v4419_v43  ;;  %v5046_v4 = vld [vmem:[#allocation4 + $0x2ec] sm:$0xf]  ;;  %v4533_v43 = vld [vmem:[#allocation4 + $0x378] sm:$0xf0] }
 0x15f   :  { %2783 = vmatpush.bf16.msra.mxu1 %v4280_v58  ;;  %2695 = vmatpush.bf16.msra.mxu2 %v4352_v52  ;;  %v4404_v52 = vor.u32 %v5032_v48, %v4403_v47  ;;  %v4517_v47 = vld [vmem:[#allocation4 + $0x358] sm:$0xf0] }
 0x160   :  { %v1740_v18 = vadd.f32 %v1739_v27, %v1727_v55  ;;  %v5028_v55 = vld [vmem:[#allocation4 + $0x254] sm:$0xf0] }
 0x161   :  { %2708 = vmatpush.bf16.msra.mxu3 %v4480_v53  ;;  %v4532_v53 = vor.u32 %v5064_v51, %v4531_v50 }
 0x162   :  { %2771 = vmatpush.bf16.msra.mxu0 %v4136_v10  ;;  %v1812_v10 = vperm.slane %v1810_v0, 0  ;;  %v4499_v0 = vld [vmem:[#allocation4 + $0x328] sm:$0xf] }
 0x163   :  { %2784 = vmatpush.bf16.msra.mxu1 %v4264_v13 }
 0x164   :  { %v1822_v13 = vunpack.c.l.bf16 %v1812_v10  ;;  %v5052_v10 = vld [vmem:[#allocation4 + $0x314] sm:$0xf0] }
 0x166   :  { %2772 = vmatpush.bf16.msra.mxu0 %v4120_v26 }
 0x167   :  { %2785 = vmatpush.bf16.msra.mxu1 %v4248_v30  ;;  %v5044_v30 = vld [vmem:[#allocation4 + $0x2d4] sm:$0xf0] }
 0x168   :  { %v4452_v62 = vor.u32 %v5044_v30, %v4451_v37  ;;  %v5034_v30 = vld [vmem:[#allocation4 + $0x28c] sm:$0xf] }
 0x16a   :  { %2773 = vmatpush.bf16.msra.mxu0 %v4104_v38  ;;  %v4436_v38 = vor.u32 %v5040_v34, %v4435_v33  ;;  %v4424_v34 = vor.u32 %v5034_v30, %v4421_v31 }
 0x16b   :  { %2786 = vmatpush.bf16.msra.mxu1 %v4232_v45  ;;  %v1765_v21 = vpop.f32.mrf.mxu1  ;;  %v4547_v45 = vld [vmem:[#allocation4 + $0x388] sm:$0xf] }
 0x16c   :  { %v1752_v58 = vpop.f32.mrf.mxu0  ;;  %v4548_v46 = vor.u32 %v5068_v63, %v4547_v45  ;;  %v5026_v63 = vld [vmem:[#allocation4 + $0x24c] sm:$0xf] }
 0x16d   :  { %2774 = vmatmul.bf16.vlgmr.msra.gmra.mxu0 %v5293_v8  ;;  %v1753_v59 = vadd.f32 %v1752_v58, %v1740_v18  ;;  %v5060_v18 = vld [vmem:[#allocation4 + $0x354] sm:$0xf0]  ;;  %v4388_v58 = vor.u32 %v5028_v55, %v4387_v54  ;;  %v5022_v54 = vld [vmem:[#allocation4 + $0x22c] sm:$0xf]  ;;  %v4373_v55 = vld [vmem:[#allocation4 + $0x238] sm:$0xf0] }
 0x16e   :  { %2787 = vmatmul.bf16.vlgmr.msra.gmra.mxu1 %v5295_v9  ;;  %v1688_v9 = vadd.f32 %v5307_v25, %v1675_v60  ;;  %v5048_v25 = vld [vmem:[#allocation4 + $0x2f4] sm:$0xf0] }
 0x16f   :  { %v1766_v8 = vadd.f32 %v1765_v21, %v1753_v59  ;;  %v4468_v26 = vor.u32 %v5048_v25, %v4467_v16  ;;  %v4516_v21 = vor.u32 %v5060_v18, %v4515_v57  ;;  %v4371_v59 = vld [vmem:[#allocation4 + $0x228] sm:$0xf]  ;;  %v5024_v60 = vld [vmem:[#allocation4 + $0x234] sm:$0xf0]  ;;  %v4581_v16 = vld [vmem:[#allocation4 + $0x3d8] sm:$0xf0] }
 0x170   :  { %v1701_v3 = vadd.f32 %v5311_v49, %v1688_v9  ;;  %v4355_v9 = vld [vmem:[#allocation4 + $0x208] sm:$0xf]  ;;  %v5054_v57 = vld [vmem:[#allocation4 + $0x32c] sm:$0xf]  ;;  %v4501_v18 = vld [vmem:[#allocation4 + $0x338] sm:$0xf0] }
 0x173   :  { %v1778_v2 = vpop.f32.mrf.mxu2  ;;  %v1791_v7 = vpop.f32.mrf.mxu3 }
 0x174   :  { %v1779_v5 = vadd.f32 %v1778_v2, %v1766_v8  ;;  %v1754_v20 = vpop.f32.mrf.mxu0  ;;  %v1767_v56 = vpop.f32.mrf.mxu1  ;;  %v4372_v8 = vor.u32 %v5024_v60, %v4371_v59  ;;  %v4500_v2 = vor.u32 %v5056_v1, %v4499_v0  ;;  %v5018_v59 = vld [vmem:[#allocation4 + $0x20c] sm:$0xf]  ;;  %v4357_v60 = vld [vmem:[#allocation4 + $0x218] sm:$0xf0] }
 0x175   :  { %v4469_v20 = vld [vmem:[#allocation4 + $0x2f8] sm:$0xf0]  ;;  %v5078_v56 = vld [vmem:[#allocation4 + $0x3ec] sm:$0xf] }
 0x176   :  { %v1792_v11 = vadd.f32 %v1791_v7, %v1779_v5  ;;  %v5020_v5 = vld [vmem:[#allocation4 + $0x214] sm:$0xf0]  ;;  %v4483_v7 = vld [vmem:[#allocation4 + $0x308] sm:$0xf]  ;;  %v5050_v0 = vld [vmem:[#allocation4 + $0x30c] sm:$0xf] }
 0x177   :  { %v4485_v1 = vld [vmem:[#allocation4 + $0x318] sm:$0xf0] }
 0x178   :  { %v1796_v12 = vpack.c.bf16 %v1792_v11, %v1701_v3  ;;  %v4597_v3 = vld [vmem:[#allocation4 + $0x3f8] sm:$0xf0]  ;;  %v4356_v11 = vor.u32 %v5020_v5, %v4355_v9  ;;  %v4360_v9 = vor.u32 %v5018_v59, %v4357_v60  ;;  %v4488_v5 = vor.u32 %v5050_v0, %v4485_v1 }
 0x17a   :  { %v1818_v27 = vunpack.c.l.bf16 %v1796_v12  ;;  %v1819_v6 = vunpack.c.h.bf16 %v1796_v12  ;;  %v4484_v12 = vor.u32 %v5052_v10, %v4483_v7 }
 0x17b   :  { %v1780_v15 = vpop.f32.mrf.mxu2  ;;  %v1793_v22 = vpop.f32.mrf.mxu3 }
 0x17c   :  { %v1826_v17 = vadd.f32 %v1822_v13, %v1818_v27  ;;  %v1827_v19 = vadd.f32 %v1823_v14, %v1819_v6  ;;  %v4472_v13 = vor.u32 %v5046_v4, %v4469_v20  ;;  %v4600_v14 = vor.u32 %v5078_v56, %v4597_v3  ;;  %v5042_v27 = vld [vmem:[#allocation4 + $0x2cc] sm:$0xf]  ;;  %v4453_v6 = vld [vmem:[#allocation4 + $0x2d8] sm:$0xf0] }
 0x17d   :  { %v5074_v15 = vld [vmem:[#allocation4 + $0x3cc] sm:$0xf]  ;;  %v4456_v25 = vor.u32 %v5042_v27, %v4453_v6 }
 0x17e   :  { %v1836_v40 = vmax.f32 %v1826_v17, 0.0  ;;  %v1837_v41 = vmax.f32 %v1827_v19, 0.0  ;;  %v4584_v23 = vor.u32 %v5074_v15, %v4581_v16  ;;  %v5086_v15 = vld [vmem:[%s5458_s5 + $0x28] sm:$0xff] }
 0x17f   :  { %v5094_v16 = vld [vmem:[%s5458_s5 + $0x68] sm:$0xff] }
 0x180   :  { %v5327_v49 = vpack.c.bf16 %v1836_v40, %v1836_v40  ;;  %v5329_v29 = vpack.c.bf16 %v1837_v41, %v1837_v41  ;;  %v4437_v40 = vld [vmem:[#allocation4 + $0x2b8] sm:$0xf0]  ;;  %v5070_v41 = vld [vmem:[#allocation4 + $0x3ac] sm:$0xf] }
 0x182   :  { %2644 = vmatmul.bf16.vlgmr.msrb.gmra.mxu2 %v5327_v49  ;;  %2657 = vmatmul.bf16.vlgmr.msrb.gmra.mxu3 %v5329_v29 }
 0x183   :  { %2740 = vmatpush.bf16.msrb.mxu2 %v4468_v26  ;;  %2753 = vmatpush.bf16.msrb.mxu3 %v4596_v28  ;;  %v4565_v26 = vld [vmem:[#allocation4 + $0x3b8] sm:$0xf0]  ;;  %v4440_v28 = vor.u32 %v5038_v24, %v4437_v40  ;;  %v5083_v24 = vld [vmem:[%s5458_s5 + $0x10] sm:$0xff] }
 0x184   :  { %v4568_v37 = vor.u32 %v5070_v41, %v4565_v26  ;;  %v5091_v40 = vld [vmem:[%s5458_s5 + $0x50] sm:$0xff]  ;;  %v5082_v41 = vld [vmem:[%s5458_s5 + $0x8] sm:$0xff] }
 0x185   :  { %v5090_v26 = vld [vmem:[%s5458_s5 + $0x48] sm:$0xff] }
 0x187   :  { %2741 = vmatpush.bf16.msrb.mxu2 %v4452_v62  ;;  %2754 = vmatpush.bf16.msrb.mxu3 %v4580_v61  ;;  %v4549_v62 = vld [vmem:[#allocation4 + $0x398] sm:$0xf0] }
 0x188   :  { %v4552_v35 = vor.u32 %v5066_v32, %v4549_v62 }
 0x18b   :  { %2742 = vmatpush.bf16.msrb.mxu2 %v4436_v38  ;;  %2755 = vmatpush.bf16.msrb.mxu3 %v4564_v39  ;;  %v4405_v38 = vld [vmem:[#allocation4 + $0x278] sm:$0xf0]  ;;  %v5062_v39 = vld [vmem:[#allocation4 + $0x36c] sm:$0xf] }
 0x18c   :  { %v4408_v44 = vor.u32 %v5030_v36, %v4405_v38  ;;  %v4536_v45 = vor.u32 %v5062_v39, %v4533_v43  ;;  %v5103_v36 = vld [vmem:[%s5458_s5 + $0xb0] sm:$0xff] }
 0x18d   :  { %v5111_v38 = vld [vmem:[%s5458_s5 + $0xf0] sm:$0xff] }
 0x18f   :  { %2743 = vmatpush.bf16.msrb.mxu2 %v4420_v42  ;;  %2756 = vmatpush.bf16.msrb.mxu3 %v4548_v46  ;;  %v4389_v42 = vld [vmem:[#allocation4 + $0x258] sm:$0xf0]  ;;  %v5058_v46 = vld [vmem:[#allocation4 + $0x34c] sm:$0xf] }
 0x192   :  { %2696 = vmatmul.bf16.vlgmr.msra.gmra.mxu2 %v5327_v49  ;;  %2709 = vmatmul.bf16.vlgmr.msra.gmra.mxu3 %v5329_v29 }
 0x193   :  { %2744 = vmatpush.bf16.msrb.mxu2 %v4404_v52  ;;  %2757 = vmatpush.bf16.msrb.mxu3 %v4532_v53  ;;  %v4392_v52 = vor.u32 %v5026_v63, %v4389_v42  ;;  %v4520_v53 = vor.u32 %v5058_v46, %v4517_v47 }
 0x197   :  { %2745 = vmatpush.bf16.msrb.mxu2 %v4388_v58  ;;  %2758 = vmatpush.bf16.msrb.mxu3 %v4516_v21  ;;  %v4376_v58 = vor.u32 %v5022_v54, %v4373_v55  ;;  %v4504_v21 = vor.u32 %v5054_v57, %v4501_v18 }
 0x198   :  { %v2619_v17 = vpop.f32.mrf.mxu0 }
 0x199   :  { %v2632_v19 = vpop.f32.mrf.mxu1 }
 0x19a   :  { %v5335_v22 = vadd.f32 %v2632_v19, %v2619_v17  ;;  %v5085_v17 = vld [vmem:[%s5458_s5 + $0x20] sm:$0xff] }
 0x19b   :  { %2746 = vmatpush.bf16.msrb.mxu2 %v4372_v8  ;;  %2759 = vmatpush.bf16.msrb.mxu3 %v4500_v2  ;;  %v5093_v19 = vld [vmem:[%s5458_s5 + $0x60] sm:$0xff] }
 0x19f   :  { %2747 = vmatpush.bf16.msrb.mxu2 %v4356_v11  ;;  %2760 = vmatpush.bf16.msrb.mxu3 %v4484_v12 }
 0x1a0   :  { %v2621_v61 = vpop.f32.mrf.mxu0 }
 0x1a1   :  { %v2634_v33 = vpop.f32.mrf.mxu1  ;;  %v5104_v61 = vld [vmem:[%s5458_s5 + $0xb8] sm:$0xff] }
 0x1a2   :  { %2748 = vmatmul.bf16.vlgmr.msrb.gmra.mxu2 %v5327_v49  ;;  %2761 = vmatmul.bf16.vlgmr.msrb.gmra.mxu3 %v5329_v29  ;;  %v5112_v33 = vld [vmem:[%s5458_s5 + $0xf8] sm:$0xff] }
 0x1a3   :  { %2792 = vmatpush.bf16.msra.mxu2 %v4472_v13  ;;  %2805 = vmatpush.bf16.msra.mxu3 %v4600_v14  ;;  %v5088_v13 = vld [vmem:[%s5458_s5 + $0x38] sm:$0xff]  ;;  %v5095_v14 = vld [vmem:[%s5458_s5 + $0x70] sm:$0xff] }
 0x1a4   :  { %3121 = vmatpush.bf16.msrb.mxu0 %v5088_v13  ;;  %v5106_v13 = vld [vmem:[%s5458_s5 + $0xc8] sm:$0xff] }
 0x1a7   :  { %2793 = vmatpush.bf16.msra.mxu2 %v4456_v25  ;;  %2806 = vmatpush.bf16.msra.mxu3 %v4584_v23  ;;  %v5084_v25 = vld [vmem:[%s5458_s5 + $0x18] sm:$0xff] }
 0x1a8   :  { %v5092_v23 = vld [vmem:[%s5458_s5 + $0x58] sm:$0xff] }
 0x1aa   :  { %v2671_v48 = vpop.f32.mrf.mxu0 }
 0x1ab   :  { %2794 = vmatpush.bf16.msra.mxu2 %v4440_v28  ;;  %2807 = vmatpush.bf16.msra.mxu3 %v4568_v37  ;;  %v2684_v50 = vpop.f32.mrf.mxu1  ;;  %v5081_v28 = vld [vmem:[%s5458_s5] sm:$0xff] }
 0x1ac   :  { %v5339_v51 = vadd.f32 %v2684_v50, %v2671_v48  ;;  %v5089_v37 = vld [vmem:[%s5458_s5 + $0x40] sm:$0xff] }
 0x1af   :  { %2795 = vmatpush.bf16.msra.mxu2 %v4424_v34  ;;  %2808 = vmatpush.bf16.msra.mxu3 %v4552_v35  ;;  %v2823_v34 = vld [vmem:[#allocation1] sm:$0xff]  ;;  %v2824_v35 = vld [vmem:[#allocation1 + $0x9] sm:$0xff] }
 0x1b0   :  { %v2827_v39 = vpack.i.b16 %v2823_v34, %v2823_v34  ;;  %v2830_v43 = vpack.i.b16 %v2824_v35, %v2824_v35 }
 0x1b2   :  { %v2673_v8 = vpop.f32.mrf.mxu0  ;;  %v2829_v48 = vperm.slane %v2827_v39, 0  ;;  %v2832_v50 = vperm.slane %v2830_v43, 0 }
 0x1b3   :  { %2796 = vmatpush.bf16.msra.mxu2 %v4408_v44  ;;  %2809 = vmatpush.bf16.msra.mxu3 %v4536_v45  ;;  %v2686_v2 = vpop.f32.mrf.mxu1  ;;  %v5102_v44 = vld [vmem:[%s5458_s5 + $0xa8] sm:$0xff] }
 0x1b4   :  { %v5110_v45 = vld [vmem:[%s5458_s5 + $0xe8] sm:$0xff]  ;;  %v2844_v18 = vunpack.c.l.bf16 %v2832_v50  ;;  %v5100_v2 = vld [vmem:[%s5458_s5 + $0x98] sm:$0xff] }
 0x1b7   :  { %2797 = vmatpush.bf16.msra.mxu2 %v4392_v52  ;;  %2810 = vmatpush.bf16.msra.mxu3 %v4520_v53  ;;  %v5101_v52 = vld [vmem:[%s5458_s5 + $0xa0] sm:$0xff] }
 0x1b8   :  { %v5109_v53 = vld [vmem:[%s5458_s5 + $0xe0] sm:$0xff] }
 0x1bb   :  { %2798 = vmatpush.bf16.msra.mxu2 %v4376_v58  ;;  %2811 = vmatpush.bf16.msra.mxu3 %v4504_v21 }
 0x1bf   :  { %2799 = vmatpush.bf16.msra.mxu2 %v4360_v9  ;;  %2812 = vmatpush.bf16.msra.mxu3 %v4488_v5  ;;  %v5108_v9 = vld [vmem:[%s5458_s5 + $0xd8] sm:$0xff] }
 0x1c2   :  { %2800 = vmatmul.bf16.vlgmr.msra.gmra.mxu2 %v5327_v49  ;;  %2813 = vmatmul.bf16.vlgmr.msra.gmra.mxu3 %v5329_v29  ;;  %v5096_v49 = vld [vmem:[%s5458_s5 + $0x78] sm:$0xff]  ;;  %v5087_v29 = vld [vmem:[%s5458_s5 + $0x30] sm:$0xff] }
 0x1c3   :  { %3134 = vmatpush.bf16.msrb.mxu1 %v5096_v49  ;;  %3122 = vmatpush.bf16.msrb.mxu0 %v5087_v29  ;;  %v5097_v49 = vld [vmem:[%s5458_s5 + $0x80] sm:$0xff] }
 0x1c4   :  { %3147 = vmatpush.bf16.msrb.mxu2 %v5104_v61  ;;  %3160 = vmatpush.bf16.msrb.mxu3 %v5112_v33  ;;  %v5105_v29 = vld [vmem:[%s5458_s5 + $0xc0] sm:$0xff] }
 0x1c7   :  { %3135 = vmatpush.bf16.msrb.mxu1 %v5095_v14  ;;  %3123 = vmatpush.bf16.msrb.mxu0 %v5086_v15  ;;  %v2826_v15 = vld [vmem:[#allocation1 + $0x1b] sm:$0xff] }
 0x1c8   :  { %3148 = vmatpush.bf16.msrb.mxu2 %v5103_v36  ;;  %3161 = vmatpush.bf16.msrb.mxu3 %v5111_v38 }
 0x1ca   :  { %v2723_v7 = vpop.f32.mrf.mxu0 }
 0x1cb   :  { %v2736_v10 = vpop.f32.mrf.mxu1  ;;  %3136 = vmatpush.bf16.msrb.mxu1 %v5094_v16  ;;  %3124 = vmatpush.bf16.msrb.mxu0 %v5085_v17  ;;  %v2836_v17 = vpack.i.b16 %v2826_v15, %v2826_v15 }
 0x1cc   :  { %v5343_v4 = vadd.f32 %v2736_v10, %v2723_v7  ;;  %3149 = vmatpush.bf16.msrb.mxu2 %v5102_v44  ;;  %3162 = vmatpush.bf16.msrb.mxu3 %v5110_v45  ;;  %v5099_v10 = vld [vmem:[%s5458_s5 + $0x90] sm:$0xff] }
 0x1cf   :  { %3137 = vmatpush.bf16.msrb.mxu1 %v5093_v19  ;;  %3125 = vmatpush.bf16.msrb.mxu0 %v5084_v25 }
 0x1d0   :  { %3150 = vmatpush.bf16.msrb.mxu2 %v5101_v52  ;;  %3163 = vmatpush.bf16.msrb.mxu3 %v5109_v53 }
 0x1d2   :  { %v2725_v20 = vpop.f32.mrf.mxu0 }
 0x1d3   :  { %v2738_v56 = vpop.f32.mrf.mxu1  ;;  %3138 = vmatpush.bf16.msrb.mxu1 %v5092_v23  ;;  %3126 = vmatpush.bf16.msrb.mxu0 %v5083_v24 }
 0x1d4   :  { %3151 = vmatpush.bf16.msrb.mxu2 %v5100_v2  ;;  %3164 = vmatpush.bf16.msrb.mxu3 %v5108_v9 }
 0x1d7   :  { %3139 = vmatpush.bf16.msrb.mxu1 %v5091_v40  ;;  %3127 = vmatpush.bf16.msrb.mxu0 %v5082_v41  ;;  %v2838_v41 = vperm.slane %v2836_v17, 0 }
 0x1d8   :  { %3152 = vmatpush.bf16.msrb.mxu2 %v5099_v10 }
 0x1db   :  { %3140 = vmatpush.bf16.msrb.mxu1 %v5090_v26  ;;  %3128 = vmatpush.bf16.msrb.mxu0 %v5081_v28 }
 0x1df   :  { %3141 = vmatpush.bf16.msrb.mxu1 %v5089_v37 }
 0x1ea   :  { %v2775_v3 = vpop.f32.mrf.mxu0 }
 0x1eb   :  { %v2788_v11 = vpop.f32.mrf.mxu1 }
 0x1ec   :  { %v5345_v12 = vadd.f32 %v2788_v11, %v2775_v3  ;;  %v5107_v3 = vld [vmem:[%s5458_s5 + $0xd0] sm:$0xff]  ;;  %v5098_v11 = vld [vmem:[%s5458_s5 + $0x88] sm:$0xff] }
 0x1ed   :  { %3165 = vmatpush.bf16.msrb.mxu3 %v5107_v3  ;;  %3153 = vmatpush.bf16.msrb.mxu2 %v5098_v11 }
 0x1f1   :  { %3166 = vmatpush.bf16.msrb.mxu3 %v5106_v13  ;;  %3154 = vmatpush.bf16.msrb.mxu2 %v5097_v49 }
 0x1f2   :  { %v2777_v27 = vpop.f32.mrf.mxu0 }
 0x1f3   :  { %v2790_v6 = vpop.f32.mrf.mxu1 }
 0x1f4   :  { %v2825_v6 = vld [vmem:[#allocation1 + $0x12] sm:$0xff] }
 0x1f5   :  { %3167 = vmatpush.bf16.msrb.mxu3 %v5105_v29  ;;  %v2833_v16 = vpack.i.b16 %v2825_v6, %v2825_v6 }
 0x1f7   :  { %v2835_v40 = vperm.slane %v2833_v16, 0 }
 0x205   :  { %v2645_v30 = vpop.f32.mrf.mxu2  ;;  %v2658_v31 = vpop.f32.mrf.mxu3 }
 0x206   :  { %v2646_v63 = vadd.f32 %v2645_v30, %v5335_v22  ;;  %v2843_v22 = vunpack.c.l.bf16 %v2829_v48  ;;  %v2845_v30 = vunpack.c.l.bf16 %v2835_v40 }
 0x208   :  { %v2659_v54 = vadd.f32 %v2658_v31, %v2646_v63  ;;  %v2846_v31 = vunpack.c.l.bf16 %v2838_v41  ;;  %v3174_v63 = vld [vmem:[%s5459_s6] sm:$0x1] }
 0x20d   :  { %v2647_v32 = vpop.f32.mrf.mxu2  ;;  %v2660_v62 = vpop.f32.mrf.mxu3 }
 0x215   :  { %v2697_v42 = vpop.f32.mrf.mxu2  ;;  %v2710_v46 = vpop.f32.mrf.mxu3 }
 0x216   :  { %v2698_v47 = vadd.f32 %v2697_v42, %v5339_v51  ;;  %v3176_v42 = vpack.i.b16 %v3174_v63, %v3174_v63 }
 0x218   :  { %v2711_v55 = vadd.f32 %v2710_v46, %v2698_v47  ;;  %v3178_v52 = vperm.slane %v3176_v42, 0 }
 0x21a   :  { %v2818_v57 = vpack.c.bf16 %v2711_v55, %v2659_v54  ;;  %v3180_v55 = vunpack.c.l.bf16 %v3178_v52 }
 0x21c   :  { %v2839_v51 = vunpack.c.l.bf16 %v2818_v57  ;;  %v2840_v58 = vunpack.c.h.bf16 %v2818_v57 }
 0x21d   :  { %v2699_v21 = vpop.f32.mrf.mxu2  ;;  %v2712_v59 = vpop.f32.mrf.mxu3 }
 0x21e   :  { %v2847_v60 = vadd.f32 %v2843_v22, %v2839_v51  ;;  %v2848_v0 = vadd.f32 %v2844_v18, %v2840_v58 }
 0x220   :  { %v2857_v1 = vmax.f32 %v2847_v60, 0.0  ;;  %v2858_v8 = vmax.f32 %v2848_v0, 0.0 }
 0x222   :  { %v2861_v5 = vpack.c.bf16 %v2857_v1, %v2857_v1  ;;  %v2862_v7 = vpack.c.bf16 %v2858_v8, %v2858_v8 }
 0x224   :  { %3129 = vmatmul.bf16.vlgmr.msrb.gmra.mxu0 %v2861_v5  ;;  %3142 = vmatmul.bf16.vlgmr.msrb.gmra.mxu1 %v2862_v7 }
 0x225   :  { %v2749_v20 = vpop.f32.mrf.mxu2  ;;  %v2762_v56 = vpop.f32.mrf.mxu3 }
 0x226   :  { %v2750_v19 = vadd.f32 %v2749_v20, %v5343_v4 }
 0x228   :  { %v2763_v26 = vadd.f32 %v2762_v56, %v2750_v19 }
 0x22d   :  { %v2751_v14 = vpop.f32.mrf.mxu2  ;;  %v2764_v27 = vpop.f32.mrf.mxu3 }
 0x245   :  { %v2801_v25 = vpop.f32.mrf.mxu2  ;;  %v2814_v23 = vpop.f32.mrf.mxu3 }
 0x246   :  { %v2802_v24 = vadd.f32 %v2801_v25, %v5345_v12 }
 0x248   :  { %v2815_v28 = vadd.f32 %v2814_v23, %v2802_v24 }
 0x24a   :  { %v2819_v37 = vpack.c.bf16 %v2815_v28, %v2763_v26 }
 0x24c   :  { %v2841_v32 = vunpack.c.l.bf16 %v2819_v37  ;;  %v2842_v62 = vunpack.c.h.bf16 %v2819_v37 }
 0x24d   :  { %v2803_v61 = vpop.f32.mrf.mxu2  ;;  %v2816_v33 = vpop.f32.mrf.mxu3 }
 0x24e   :  { %v2849_v34 = vadd.f32 %v2845_v30, %v2841_v32  ;;  %v2850_v35 = vadd.f32 %v2846_v31, %v2842_v62 }
 0x250   :  { %v2859_v36 = vmax.f32 %v2849_v34, 0.0  ;;  %v2860_v38 = vmax.f32 %v2850_v35, 0.0 }
 0x252   :  { %v2863_v4 = vpack.c.bf16 %v2859_v36, %v2859_v36  ;;  %v2864_v39 = vpack.c.bf16 %v2860_v38, %v2860_v38 }
 0x254   :  { %3155 = vmatmul.bf16.vlgmr.msrb.gmra.mxu2 %v2863_v4  ;;  %3168 = vmatmul.bf16.vlgmr.msrb.gmra.mxu3 %v2864_v39 }
 0x2a1   :  { %v3130_v12 = vpop.f32.mrf.mxu0  ;;  %v3143_v43 = vpop.f32.mrf.mxu1 }
 0x2a2   :  { %v3144_v46 = vadd.f32 %v3143_v43, %v3130_v12 }
 0x2a9   :  { %v3132_v44 = vpop.f32.mrf.mxu0  ;;  %v3145_v45 = vpop.f32.mrf.mxu1 }
 0x2d7   :  { %v3156_v47 = vpop.f32.mrf.mxu2  ;;  %v3169_v48 = vpop.f32.mrf.mxu3 }
 0x2d8   :  { %v3157_v50 = vadd.f32 %v3156_v47, %v3144_v46 }
 0x2da   :  { %v3170_v53 = vadd.f32 %v3169_v48, %v3157_v50 }
 0x2dc   :  { %v3173_v54 = vpack.c.bf16 %v3170_v53, %v3170_v53 }
 0x2de   :  { %v3179_v57 = vunpack.c.l.bf16 %v3173_v54 }
 0x2df   :  { %v3158_v22 = vpop.f32.mrf.mxu2  ;;  %v3171_v18 = vpop.f32.mrf.mxu3 }
 0x2e0   :  { %v3181_v51 = vadd.f32 %v3180_v55, %v3179_v57 }
 0x2e2   :  { %v3184_v58 = vmax.f32 %v3181_v51, 0.0 }
 0x2e4   :  { %v3185_v21 = vpack.c.bf16 %v3184_v58, %v3184_v58 }
 0x2e6   :  { %3186 = vst [vmem:[%s5460_s7] sm:$0xf] %v3185_v21 }
 0x2e7   :  { %3191 = vsyncpa [#allocation3], 1 }
 0x2e8   :  { %3192 = vsyncpa [#allocation5], 1 }

</bundles_post_ra>
